<compile_context>
chip_gen: v6e
topology: v6e:2x2x1
jax: 0.10.0
libtpu: 0.0.40
codegen_flags: <defaults>
</compile_context>

<pallas_src>
import functools
import math

import jax
import jax.numpy as jnp
from jax.experimental import pallas as pl
from jax.experimental.pallas import tpu as pltpu


# ----------------------------------------------------------------------------
# helpers
# ----------------------------------------------------------------------------

def _round_up(v: int, m: int) -> int:
    return (v + m - 1) // m * m


def _pad2(a, rows, cols, dtype=None):
    out = jnp.pad(a, ((0, rows - a.shape[0]), (0, cols - a.shape[1])))
    return out if dtype is None else out.astype(dtype)


# ----------------------------------------------------------------------------
# fused forward kernel (single invocation, full VMEM-resident blocks)
# ----------------------------------------------------------------------------

def _fused_forward_kernel(alpha, num_layers, num_mlp_hidden, out_valid,
                          use_softmax,
                          betas_ref,                      # SMEM (L,)
                          x_ref, a_ref,                   # VMEM (bf16)
                          init_w_ref, init_b_ref,
                          conv_w_ref,                     # (L, H_p, H_p) bf16
                          mlp_w_ref, mlp_b_ref,           # (M, H_p, H_p)/(M,1,H_p)
                          out_w_ref, out_b_ref,
                          o_ref):
    f32 = jnp.float32
    bf16 = jnp.bfloat16

    # --- init layer: relu(x @ W + b)  (dropout = identity at inference) ---
    h = jnp.dot(x_ref[...], init_w_ref[...], preferred_element_type=f32)
    h = jnp.maximum(h + init_b_ref[...], 0.0)
    init_x = h

    a_bf = a_ref[...]                      # bf16 MXU operand, VMEM resident

    # --- GCNII-style ScaleGConv layers (trace-time unrolled; one compile) ---
    for i in range(num_layers):
        beta = betas_ref[i]                # per-layer scalar from SMEM
        p = jnp.dot(a_bf, h.astype(bf16), preferred_element_type=f32)
        s = (1.0 - alpha) * p + alpha * init_x
        t = jnp.dot(s.astype(bf16), conv_w_ref[i], preferred_element_type=f32)
        y = (1.0 - beta) * s + beta * t + h          # + outer skip connection
        h = jnp.where(y > 0.0, y, 0.1 * y)           # leaky_relu(0.1)

    # --- MLP hidden layers: relu(h @ W + b) + h  (res_connect, no BN) ---
    for i in range(num_mlp_hidden):
        z = jnp.dot(h.astype(bf16), mlp_w_ref[i], preferred_element_type=f32)
        h = jnp.maximum(z + mlp_b_ref[i], 0.0) + h

    # --- final linear (+ masked log_softmax on the lane-padded output) ---
    logits = jnp.dot(h.astype(bf16), out_w_ref[...], preferred_element_type=f32)
    logits = logits + out_b_ref[...]
    if use_softmax:
        col = jax.lax.broadcasted_iota(jnp.int32, logits.shape, 1)
        logits = jnp.where(col < out_valid, logits, -1e30)
        m = jnp.max(logits, axis=-1, keepdims=True)
        z = logits - m
        lse = jnp.log(jnp.sum(jnp.exp(z), axis=-1, keepdims=True))
        o_ref[...] = z - lse
    else:
        o_ref[...] = logits


# ----------------------------------------------------------------------------
# model wrapper (glue in plain JAX)
# ----------------------------------------------------------------------------

def gcn_norm_dense(edge_index, num_nodes):
    """Dense GCN normalization with self loops: D^-1/2 (A+I) D^-1/2."""
    src, dst = edge_index[0], edge_index[1]
    a = jnp.zeros((num_nodes, num_nodes), jnp.float32)
    a = a.at[src, dst].set(1.0)
    a = jnp.maximum(a, jnp.eye(num_nodes, dtype=jnp.float32))  # add self loops
    deg = jnp.sum(a, axis=1)
    d_inv_sqrt = jnp.where(deg > 0, 1.0 / jnp.sqrt(deg), 0.0)
    return d_inv_sqrt[:, None] * a * d_inv_sqrt[None, :]


def make_params(key, in_channels, hidden_channels, out_channels,
                num_layers, num_final_update):
    keys = jax.random.split(key, 2 + num_layers + 2 * num_final_update)
    ki = iter(range(len(keys)))

    def glorot(k, shape):
        fan_in, fan_out = shape
        lim = math.sqrt(6.0 / (fan_in + fan_out))
        return jax.random.uniform(k, shape, jnp.float32, -lim, lim)

    params = {
        "init_w": glorot(keys[next(ki)], (in_channels, hidden_channels)),
        "init_b": 0.01 * jax.random.normal(keys[next(ki)], (1, hidden_channels),
                                           jnp.float32),
        "conv_w": [glorot(keys[next(ki)], (hidden_channels, hidden_channels))
                   for _ in range(num_layers)],
    }
    mlp_hidden_params = []
    for _ in range(num_final_update - 1):
        w = glorot(keys[next(ki)], (hidden_channels, hidden_channels))
        b = 0.01 * jax.random.normal(keys[next(ki)], (1, hidden_channels),
                                     jnp.float32)
        mlp_hidden_params.append((w, b))
    params["mlp_hidden"] = mlp_hidden_params
    params["out_w"] = glorot(keys[next(ki)], (hidden_channels, out_channels))
    params["out_b"] = 0.01 * jax.random.normal(keys[next(ki)],
                                               (1, out_channels), jnp.float32)
    return params


def scale_gcn_forward(params, x, edge_index, *, num_layers, alpha=0.1,
                      beta_base=0.5, fix_beta=False, use_softmax=True):
    n, in_ch = x.shape
    hidden = params["init_w"].shape[1]
    out_ch = params["out_w"].shape[1]
    num_mlp = len(params["mlp_hidden"])

    # lane-pad every matmul dim to 128 (still tiny at demo size); keeps all
    # MXU contractions and the output store lane-dense/unmasked.
    n_p = _round_up(n, 128)
    f_p = _round_up(in_ch, 128)
    h_p = _round_up(hidden, 128)
    c_p = _round_up(out_ch, 128)

    a_hat = gcn_norm_dense(edge_index, n)

    # padded operands; bf16 for MXU inputs, f32 for biases / betas
    x_p = _pad2(x, n_p, f_p, jnp.bfloat16)
    a_p = _pad2(a_hat, n_p, n_p, jnp.bfloat16)
    init_w = _pad2(params["init_w"], f_p, h_p, jnp.bfloat16)
    init_b = _pad2(params["init_b"], 1, h_p)
    if num_layers > 0:
        conv_w = jnp.stack([_pad2(w, h_p, h_p, jnp.bfloat16)
                            for w in params["conv_w"]])
        betas = jnp.array(
            [beta_base if fix_beta else math.log(beta_base / (i + 1) + 1.0)
             for i in range(num_layers)], jnp.float32)
    else:
        conv_w = jnp.zeros((1, h_p, h_p), jnp.bfloat16)   # unused dummy
        betas = jnp.zeros((1,), jnp.float32)
    if num_mlp > 0:
        mlp_w = jnp.stack([_pad2(w, h_p, h_p, jnp.bfloat16)
                           for (w, _) in params["mlp_hidden"]])
        mlp_b = jnp.stack([_pad2(b, 1, h_p) for (_, b) in params["mlp_hidden"]])
    else:
        mlp_w = jnp.zeros((1, h_p, h_p), jnp.bfloat16)    # unused dummy
        mlp_b = jnp.zeros((1, 1, h_p), jnp.float32)
    out_w = _pad2(params["out_w"], h_p, c_p, jnp.bfloat16)
    out_b = _pad2(params["out_b"], 1, c_p)

    kernel = functools.partial(_fused_forward_kernel, float(alpha),
                               int(num_layers), int(num_mlp), int(out_ch),
                               bool(use_softmax))
    vmem = pl.BlockSpec(memory_space=pltpu.MemorySpace.VMEM)
    smem = pl.BlockSpec(memory_space=pltpu.MemorySpace.SMEM)

    out_p = pl.pallas_call(
        kernel,
        out_shape=jax.ShapeDtypeStruct((n_p, c_p), jnp.float32),
        in_specs=[smem] + [vmem] * 9,
        out_specs=vmem,
    )(betas, x_p, a_p, init_w, init_b, conv_w, mlp_w, mlp_b, out_w, out_b)

    # slice the lane/sublane padding back off
    return out_p[:n, :out_ch]


# ----------------------------------------------------------------------------
# Main
# ----------------------------------------------------------------------------

if __name__ == "__main__":
    N = 16               # number of nodes
    IN_CHANNELS = 8
    HIDDEN_CHANNELS = 32
    OUT_CHANNELS = 4
    NUM_LAYERS = 2
    NUM_FINAL_UPDATE = 2

    key = jax.random.PRNGKey(0)
    k_x, k_p = jax.random.split(key)

    # deterministic node features
    x = jax.random.normal(k_x, (N, IN_CHANNELS), jnp.float32)

    # deterministic small graph: ring +-1 and +-3 neighbors (64 directed edges)
    src = []
    dst = []
    for i in range(N):
        for d in (1, 3):
            src += [i, (i + d) % N]
            dst += [(i + d) % N, i]
    edge_index = jnp.array([src, dst], dtype=jnp.int32)

    params = make_params(k_p, IN_CHANNELS, HIDDEN_CHANNELS, OUT_CHANNELS,
                         NUM_LAYERS, NUM_FINAL_UPDATE)

    fwd = jax.jit(functools.partial(scale_gcn_forward,
                                    num_layers=NUM_LAYERS, alpha=0.1,
                                    beta_base=0.5, fix_beta=False,
                                    use_softmax=True))
    out = fwd(params, x, edge_index)
    out = jax.block_until_ready(out)

    assert out.shape == (N, OUT_CHANNELS)
    # rows of log_softmax must exp-sum to 1
    assert jnp.allclose(jnp.sum(jnp.exp(out), axis=1), 1.0, atol=1e-3)
    print("KERNEL_OK")
</pallas_src>

<mosaic_0001>
module attributes {stable_mosaic.version = 11 : i64} {
  func.func @_fused_forward_kernel(%arg0: memref<2xf32, #tpu.memory_space<smem>>, %arg1: memref<128x128xbf16, #tpu.memory_space<vmem>>, %arg2: memref<128x128xbf16, #tpu.memory_space<vmem>>, %arg3: memref<128x128xbf16, #tpu.memory_space<vmem>>, %arg4: memref<1x128xf32, #tpu.memory_space<vmem>>, %arg5: memref<2x128x128xbf16, #tpu.memory_space<vmem>>, %arg6: memref<1x128x128xbf16, #tpu.memory_space<vmem>>, %arg7: memref<1x1x128xf32, #tpu.memory_space<vmem>>, %arg8: memref<128x128xbf16, #tpu.memory_space<vmem>>, %arg9: memref<1x128xf32, #tpu.memory_space<vmem>>, %arg10: memref<128x128xf32, #tpu.memory_space<vmem>>) attributes {dimension_semantics = [], scalar_prefetch = 0 : i64, scratch_operands = 0 : i64, tpu.core_type = #tpu.core_type<tc>} {
    %c0 = arith.constant 0 : index
    %c0_0 = arith.constant 0 : index
    %0 = vector.load %arg1[%c0, %c0_0] : memref<128x128xbf16, #tpu.memory_space<vmem>>, vector<128x128xbf16>
    %c0_1 = arith.constant 0 : index
    %c0_2 = arith.constant 0 : index
    %1 = vector.load %arg3[%c0_1, %c0_2] : memref<128x128xbf16, #tpu.memory_space<vmem>>, vector<128x128xbf16>
    %cst = arith.constant dense<0.000000e+00> : vector<128x128xf32>
    %2 = tpu.matmul %0, %1, %cst {dimension_numbers = #tpu.dot_dimension_numbers<[1], [0], [0], [1], [0, 0, 1, 1], [], []>} : vector<128x128xbf16>, vector<128x128xbf16>, vector<128x128xf32> -> vector<128x128xf32>
    %c0_3 = arith.constant 0 : index
    %c0_4 = arith.constant 0 : index
    %3 = vector.load %arg4[%c0_3, %c0_4] : memref<1x128xf32, #tpu.memory_space<vmem>>, vector<1x128xf32>
    %4 = vector.broadcast %3 : vector<1x128xf32> to vector<128x128xf32>
    %5 = arith.addf %2, %4 : vector<128x128xf32>
    %cst_5 = arith.constant 0.000000e+00 : f32
    %6 = vector.broadcast %cst_5 : f32 to vector<128x128xf32>
    %7 = arith.maximumf %5, %6 : vector<128x128xf32>
    %c0_6 = arith.constant 0 : index
    %c0_7 = arith.constant 0 : index
    %8 = vector.load %arg2[%c0_6, %c0_7] : memref<128x128xbf16, #tpu.memory_space<vmem>>, vector<128x128xbf16>
    %c0_8 = arith.constant 0 : index
    %9 = memref.load %arg0[%c0_8] : memref<2xf32, #tpu.memory_space<smem>>
    %10 = arith.truncf %7 : vector<128x128xf32> to vector<128x128xbf16>
    %cst_9 = arith.constant dense<0.000000e+00> : vector<128x128xf32>
    %11 = tpu.matmul %8, %10, %cst_9 {dimension_numbers = #tpu.dot_dimension_numbers<[1], [0], [0], [1], [0, 0, 1, 1], [], []>} : vector<128x128xbf16>, vector<128x128xbf16>, vector<128x128xf32> -> vector<128x128xf32>
    %cst_10 = arith.constant 0.899999976 : f32
    %12 = vector.broadcast %cst_10 : f32 to vector<128x128xf32>
    %13 = arith.mulf %12, %11 : vector<128x128xf32>
    %cst_11 = arith.constant 1.000000e-01 : f32
    %14 = vector.broadcast %cst_11 : f32 to vector<128x128xf32>
    %15 = arith.mulf %14, %7 : vector<128x128xf32>
    %16 = arith.addf %13, %15 : vector<128x128xf32>
    %17 = arith.truncf %16 : vector<128x128xf32> to vector<128x128xbf16>
    %c0_12 = arith.constant 0 : index
    %c0_13 = arith.constant 0 : index
    %c0_14 = arith.constant 0 : index
    %18 = vector.load %arg5[%c0_12, %c0_13, %c0_14] : memref<2x128x128xbf16, #tpu.memory_space<vmem>>, vector<1x128x128xbf16>
    %19 = vector.shape_cast %18 : vector<1x128x128xbf16> to vector<128x128xbf16>
    %cst_15 = arith.constant dense<0.000000e+00> : vector<128x128xf32>
    %20 = tpu.matmul %17, %19, %cst_15 {dimension_numbers = #tpu.dot_dimension_numbers<[1], [0], [0], [1], [0, 0, 1, 1], [], []>} : vector<128x128xbf16>, vector<128x128xbf16>, vector<128x128xf32> -> vector<128x128xf32>
    %cst_16 = arith.constant 1.000000e+00 : f32
    %21 = arith.subf %cst_16, %9 : f32
    %22 = vector.broadcast %21 : f32 to vector<128x128xf32>
    %23 = arith.mulf %22, %16 : vector<128x128xf32>
    %24 = vector.broadcast %9 : f32 to vector<128x128xf32>
    %25 = arith.mulf %24, %20 : vector<128x128xf32>
    %26 = arith.addf %23, %25 : vector<128x128xf32>
    %27 = arith.addf %26, %7 : vector<128x128xf32>
    %cst_17 = arith.constant 0.000000e+00 : f32
    %28 = vector.broadcast %cst_17 : f32 to vector<128x128xf32>
    %29 = arith.cmpf ogt, %27, %28 : vector<128x128xf32>
    %cst_18 = arith.constant 1.000000e-01 : f32
    %30 = vector.broadcast %cst_18 : f32 to vector<128x128xf32>
    %31 = arith.mulf %30, %27 : vector<128x128xf32>
    %32 = arith.select %29, %27, %31 : vector<128x128xi1>, vector<128x128xf32>
    %c1 = arith.constant 1 : index
    %33 = memref.load %arg0[%c1] : memref<2xf32, #tpu.memory_space<smem>>
    %34 = arith.truncf %32 : vector<128x128xf32> to vector<128x128xbf16>
    %cst_19 = arith.constant dense<0.000000e+00> : vector<128x128xf32>
    %35 = tpu.matmul %8, %34, %cst_19 {dimension_numbers = #tpu.dot_dimension_numbers<[1], [0], [0], [1], [0, 0, 1, 1], [], []>} : vector<128x128xbf16>, vector<128x128xbf16>, vector<128x128xf32> -> vector<128x128xf32>
    %cst_20 = arith.constant 0.899999976 : f32
    %36 = vector.broadcast %cst_20 : f32 to vector<128x128xf32>
    %37 = arith.mulf %36, %35 : vector<128x128xf32>
    %cst_21 = arith.constant 1.000000e-01 : f32
    %38 = vector.broadcast %cst_21 : f32 to vector<128x128xf32>
    %39 = arith.mulf %38, %7 : vector<128x128xf32>
    %40 = arith.addf %37, %39 : vector<128x128xf32>
    %41 = arith.truncf %40 : vector<128x128xf32> to vector<128x128xbf16>
    %c1_22 = arith.constant 1 : index
    %c0_23 = arith.constant 0 : index
    %c0_24 = arith.constant 0 : index
    %42 = vector.load %arg5[%c1_22, %c0_23, %c0_24] : memref<2x128x128xbf16, #tpu.memory_space<vmem>>, vector<1x128x128xbf16>
    %43 = vector.shape_cast %42 : vector<1x128x128xbf16> to vector<128x128xbf16>
    %cst_25 = arith.constant dense<0.000000e+00> : vector<128x128xf32>
    %44 = tpu.matmul %41, %43, %cst_25 {dimension_numbers = #tpu.dot_dimension_numbers<[1], [0], [0], [1], [0, 0, 1, 1], [], []>} : vector<128x128xbf16>, vector<128x128xbf16>, vector<128x128xf32> -> vector<128x128xf32>
    %cst_26 = arith.constant 1.000000e+00 : f32
    %45 = arith.subf %cst_26, %33 : f32
    %46 = vector.broadcast %45 : f32 to vector<128x128xf32>
    %47 = arith.mulf %46, %40 : vector<128x128xf32>
    %48 = vector.broadcast %33 : f32 to vector<128x128xf32>
    %49 = arith.mulf %48, %44 : vector<128x128xf32>
    %50 = arith.addf %47, %49 : vector<128x128xf32>
    %51 = arith.addf %50, %32 : vector<128x128xf32>
    %cst_27 = arith.constant 0.000000e+00 : f32
    %52 = vector.broadcast %cst_27 : f32 to vector<128x128xf32>
    %53 = arith.cmpf ogt, %51, %52 : vector<128x128xf32>
    %cst_28 = arith.constant 1.000000e-01 : f32
    %54 = vector.broadcast %cst_28 : f32 to vector<128x128xf32>
    %55 = arith.mulf %54, %51 : vector<128x128xf32>
    %56 = arith.select %53, %51, %55 : vector<128x128xi1>, vector<128x128xf32>
    %57 = arith.truncf %56 : vector<128x128xf32> to vector<128x128xbf16>
    %c0_29 = arith.constant 0 : index
    %c0_30 = arith.constant 0 : index
    %c0_31 = arith.constant 0 : index
    %58 = vector.load %arg6[%c0_29, %c0_30, %c0_31] : memref<1x128x128xbf16, #tpu.memory_space<vmem>>, vector<1x128x128xbf16>
    %59 = vector.shape_cast %58 : vector<1x128x128xbf16> to vector<128x128xbf16>
    %cst_32 = arith.constant dense<0.000000e+00> : vector<128x128xf32>
    %60 = tpu.matmul %57, %59, %cst_32 {dimension_numbers = #tpu.dot_dimension_numbers<[1], [0], [0], [1], [0, 0, 1, 1], [], []>} : vector<128x128xbf16>, vector<128x128xbf16>, vector<128x128xf32> -> vector<128x128xf32>
    %c0_33 = arith.constant 0 : index
    %c0_34 = arith.constant 0 : index
    %c0_35 = arith.constant 0 : index
    %61 = vector.load %arg7[%c0_33, %c0_34, %c0_35] : memref<1x1x128xf32, #tpu.memory_space<vmem>>, vector<1x1x128xf32>
    %62 = vector.shape_cast %61 : vector<1x1x128xf32> to vector<1x128xf32>
    %63 = vector.broadcast %62 : vector<1x128xf32> to vector<128x128xf32>
    %64 = arith.addf %60, %63 : vector<128x128xf32>
    %cst_36 = arith.constant 0.000000e+00 : f32
    %65 = vector.broadcast %cst_36 : f32 to vector<128x128xf32>
    %66 = arith.maximumf %64, %65 : vector<128x128xf32>
    %67 = arith.addf %66, %56 : vector<128x128xf32>
    %68 = arith.truncf %67 : vector<128x128xf32> to vector<128x128xbf16>
    %c0_37 = arith.constant 0 : index
    %c0_38 = arith.constant 0 : index
    %69 = vector.load %arg8[%c0_37, %c0_38] : memref<128x128xbf16, #tpu.memory_space<vmem>>, vector<128x128xbf16>
    %cst_39 = arith.constant dense<0.000000e+00> : vector<128x128xf32>
    %70 = tpu.matmul %68, %69, %cst_39 {dimension_numbers = #tpu.dot_dimension_numbers<[1], [0], [0], [1], [0, 0, 1, 1], [], []>} : vector<128x128xbf16>, vector<128x128xbf16>, vector<128x128xf32> -> vector<128x128xf32>
    %c0_40 = arith.constant 0 : index
    %c0_41 = arith.constant 0 : index
    %71 = vector.load %arg9[%c0_40, %c0_41] : memref<1x128xf32, #tpu.memory_space<vmem>>, vector<1x128xf32>
    %72 = vector.broadcast %71 : vector<1x128xf32> to vector<128x128xf32>
    %73 = arith.addf %70, %72 : vector<128x128xf32>
    %74 = tpu.iota {dimensions = array<i32: 1>} : vector<128x128xi32>
    %c4_i32 = arith.constant 4 : i32
    %75 = vector.broadcast %c4_i32 : i32 to vector<128x128xi32>
    %76 = arith.cmpi slt, %74, %75 : vector<128x128xi32>
    %cst_42 = arith.constant -1.000000e+30 : f32
    %77 = vector.broadcast %cst_42 : f32 to vector<128x128xf32>
    %78 = arith.select %76, %73, %77 : vector<128x128xi1>, vector<128x128xf32>
    %cst_43 = arith.constant dense<0xFF800000> : vector<128xf32>
    %79 = vector.multi_reduction <maximumf>, %78, %cst_43 [1] : vector<128x128xf32> to vector<128xf32>
    %80 = vector.shape_cast %79 : vector<128xf32> to vector<128x1xf32>
    %81 = vector.broadcast %80 : vector<128x1xf32> to vector<128x128xf32>
    %82 = arith.subf %78, %81 : vector<128x128xf32>
    %83 = math.exp %82 : vector<128x128xf32>
    %cst_44 = arith.constant dense<0.000000e+00> : vector<128xf32>
    %84 = vector.multi_reduction <add>, %83, %cst_44 [1] : vector<128x128xf32> to vector<128xf32>
    %85 = vector.shape_cast %84 : vector<128xf32> to vector<128x1xf32>
    %86 = math.log %85 : vector<128x1xf32>
    %87 = vector.broadcast %86 : vector<128x1xf32> to vector<128x128xf32>
    %88 = arith.subf %82, %87 : vector<128x128xf32>
    %c0_45 = arith.constant 0 : index
    %c0_46 = arith.constant 0 : index
    %89 = vector.load %arg10[%c0_45, %c0_46] : memref<128x128xf32, #tpu.memory_space<vmem>>, vector<128x128xf32>
    tpu.vector_store %arg10[%c0_45, %c0_46], %88 {strides = array<i32>} : memref<128x128xf32, #tpu.memory_space<vmem>>, vector<128x128xf32>,
    return
  }
}

</mosaic_0001>

<bundles_post_ra>
// kernel: scale_gcn_forward.1
= control target key start
LH: loop header
LB: loop body
LE: loop exit
PB: predicated region body
PF: predicated region fallthrough
CT: control target
= control target key end

     0   :  { %15 = vsyncpa [#allocation3], 0  ;;  %s3326_s0 = inlined_call_operand.vmem [shape: f32[2], index: 0, kind: input, shape index: {}]   ;;  %s3327_s1 = inlined_call_operand.vmem [shape: bf16[128,128], index: 1, kind: input, shape index: {}]   ;;  %s3328_s2 = inlined_call_operand.vmem [shape: bf16[128,128], index: 2, kind: input, shape index: {}]   ;;  %s3329_s3 = inlined_call_operand.vmem [shape: bf16[128,128], index: 3, kind: input, shape index: {}]   ;;  %s3330_s4 = inlined_call_operand.vmem [shape: f32[1,128], index: 4, kind: input, shape index: {}]   ;;  %s3331_s5 = inlined_call_operand.vmem [shape: bf16[2,128,128], index: 5, kind: input, shape index: {}]   ;;  %s3332_s6 = inlined_call_operand.vmem [shape: bf16[1,128,128], index: 6, kind: input, shape index: {}]   ;;  %s3333_s7 = inlined_call_operand.vmem [shape: f32[1,1,128], index: 7, kind: input, shape index: {}]   ;;  %s3334_s8 = inlined_call_operand.vmem [shape: bf16[128,128], index: 8, kind: input, shape index: {}]   ;;  %s3335_s9 = inlined_call_operand.vmem [shape: f32[1,128], index: 9, kind: input, shape index: {}]   ;;  %s3336_s10 = inlined_call_operand.vmem [shape: f32[128,128], index: 10, kind: output, shape index: {}]  }
   0x1   :  { %s22_s15 = sshll.u32 %s3326_s0, 4  ;;  %s23_s15 = int_to_ptr.vmem [resolvable:$true] %s22_s15 }
   0x2   :  { %s2355_s16 = scalar_lea.vmem %s23_s15, 16  ;;  %p2360_p1 = scmp.lt.s32.totalorder %s23_s15, %s23_s15 }
   0x3   :  { %p2356_p0 = scmp.ne.s32.totalorder %s23_s15, %s2355_s16  ;;  %p2361_p2 = scmp.lt.s32.totalorder %s2355_s16, %s2355_s16 }
   0x5   :  { %p2362_p3 = por %p2361_p2, %p2360_p1 }
   0x7   :  { %p2363_p4 = pnand %p2362_p3, %p2356_p0 }
   0x9   :  { %2366 = shalt.err (!%p2363_p4)
}
   0xa   :  { %s2369_s17 = smov [#allocation2]  }
   0xb   :  { %25 = dma.vmem_to_smem %s23_s15, 16, %s2369_s17, [#allocation3]  }
   0xc   :  { %2367 = dma.done.wait [#allocation3], 16  }
   0xd   :  { %2368 = vsyncadd [#allocation3], 4294967280 }
   0xe   :  { %47 = sfence }
   0xf   :  { %v2235_v0 = vld [vmem:[%s3329_s3 + $0x38] sm:$0xff]   ;;  %v2236_v1 = vld [vmem:[%s3329_s3 + $0x30] sm:$0xff]   ;;  %v2237_v2 = vld [vmem:[%s3329_s3 + $0x28] sm:$0xff]   ;;  %s313_s22 = sld [smem:[#allocation2]] }
  0x10   :  { %1994 = vmatprep.subr.bf16.mxu0 %v2235_v0  ;;  %v2238_v3 = vld [vmem:[%s3329_s3 + $0x20] sm:$0xff]   ;;  %v2239_v5 = vld [vmem:[%s3329_s3 + $0x18] sm:$0xff]   ;;  %v2240_v6 = vld [vmem:[%s3329_s3 + $0x10] sm:$0xff]   ;;  %s1839_s27 = sld [smem:[#allocation2 + $0x1]] }
  0x11   :  { %1995 = vmatpush3.bf16.msra.mxu0 %v2235_v0  ;;  %v2243_v4 = vld [vmem:[%s3327_s1] sm:$0xff]   ;;  %v2241_v7 = vld [vmem:[%s3329_s3 + $0x8] sm:$0xff]   ;;  %v2245_v10 = vld [vmem:[%s3327_s1 + $0x10] sm:$0xff]  }
  0x12   :  { %1996 = vmatprep.subr.bf16.mxu0 %v2236_v1  ;;  %2010 = vmatprep.mubr.bf16.mxu0 %v2243_v4  ;;  %v2242_v8 = vld [vmem:[%s3329_s3] sm:$0xff]   ;;  %v2244_v9 = vld [vmem:[%s3327_s1 + $0x8] sm:$0xff]   ;;  %v2246_v11 = vld [vmem:[%s3327_s1 + $0x18] sm:$0xff]  }
  0x13   :  { %v2247_v12 = vld [vmem:[%s3327_s1 + $0x20] sm:$0xff]   ;;  %v2248_v13 = vld [vmem:[%s3327_s1 + $0x28] sm:$0xff]   ;;  %v2249_v14 = vld [vmem:[%s3327_s1 + $0x30] sm:$0xff]  }
  0x14   :  { %v2250_v15 = vld [vmem:[%s3327_s1 + $0x38] sm:$0xff]   ;;  %v2479_v16 = vld [vmem:[%s3328_s2] sm:$0xff]   ;;  %v2260_v18 = vld [vmem:[%s3331_s5 + $0x30] sm:$0xff]  }
  0x15   :  { %1997 = vmatpush3.bf16.msra.mxu0 %v2236_v1  ;;  %2042 = vmatprep.mubr.bf16.mxu1 %v2479_v16  ;;  %v2259_v17 = vld [vmem:[%s3331_s5 + $0x38] sm:$0xff]   ;;  %v2261_v19 = vld [vmem:[%s3331_s5 + $0x28] sm:$0xff]   ;;  %v2262_v20 = vld [vmem:[%s3331_s5 + $0x20] sm:$0xff]   ;;  %s684_s23 = ssub.f32 1.0, %s313_s22 }
  0x16   :  { %1998 = vmatprep.subr.bf16.mxu0 %v2237_v2  ;;  %v2263_v21 = vld [vmem:[%s3331_s5 + $0x18] sm:$0xff]   ;;  %v1806_v35 = vld [vmem:[%s3330_s4] ss:$0 sm:$0xff]  ;;  %s1107_s28 = ssub.f32 1.0, %s1839_s27 }
  0x19   :  { %1999 = vmatpush3.bf16.msra.mxu0 %v2237_v2 }
  0x1a   :  { %2000 = vmatprep.subr.bf16.mxu0 %v2238_v3 }
  0x1d   :  { %2001 = vmatpush3.bf16.msra.mxu0 %v2238_v3 }
  0x1e   :  { %2002 = vmatprep.subr.bf16.mxu0 %v2239_v5 }
  0x21   :  { %2003 = vmatpush3.bf16.msra.mxu0 %v2239_v5 }
  0x22   :  { %2004 = vmatprep.subr.bf16.mxu0 %v2240_v6 }
  0x25   :  { %2005 = vmatpush3.bf16.msra.mxu0 %v2240_v6 }
  0x26   :  { %2006 = vmatprep.subr.bf16.mxu0 %v2241_v7 }
  0x29   :  { %2007 = vmatpush3.bf16.msra.mxu0 %v2241_v7 }
  0x2a   :  { %2008 = vmatprep.subr.bf16.mxu0 %v2242_v8 }
  0x2d   :  { %2009 = vmatpush3.bf16.msra.mxu0 %v2242_v8 }
  0x2e   :  { %2058 = vmatprep.subr.bf16.mxu0 %v2259_v17 }
  0x30   :  { %2011 = vmatmul.mubr.bf16.vlgmr.msra.gmra.mxu0 %v2244_v9 }
  0x31   :  { %2014 = vmatprep.mubr.bf16.mxu0 %v2245_v10  ;;  %2059 = vmatpush3.bf16.msra.mxu0 %v2259_v17  ;;  %v2556_v17 = vld [vmem:[%s3328_s2 + $0x10] sm:$0xff]  }
  0x32   :  { %2060 = vmatprep.subr.bf16.mxu0 %v2260_v18 }
  0x35   :  { %2061 = vmatpush3.bf16.msra.mxu0 %v2260_v18  ;;  %v2563_v18 = vld [vmem:[%s3328_s2 + $0x18] sm:$0xff]  }
  0x36   :  { %2062 = vmatprep.subr.bf16.mxu0 %v2261_v19 }
  0x38   :  { %2015 = vmatmul.mubr.bf16.gmra.mxu0 %v2246_v11 }
  0x39   :  { %2018 = vmatprep.mubr.bf16.mxu0 %v2247_v12  ;;  %2063 = vmatpush3.bf16.msra.mxu0 %v2261_v19  ;;  %v2568_v19 = vld [vmem:[%s3328_s2 + $0x20] sm:$0xff]  }
  0x3a   :  { %2064 = vmatprep.subr.bf16.mxu0 %v2262_v20 }
  0x3d   :  { %2065 = vmatpush3.bf16.msra.mxu0 %v2262_v20  ;;  %v2575_v20 = vld [vmem:[%s3328_s2 + $0x28] sm:$0xff]  }
  0x3e   :  { %2066 = vmatprep.subr.bf16.mxu0 %v2263_v21 }
  0x40   :  { %2019 = vmatmul.mubr.bf16.gmra.mxu0 %v2248_v13 }
  0x41   :  { %2022 = vmatprep.mubr.bf16.mxu0 %v2249_v14  ;;  %2067 = vmatpush3.bf16.msra.mxu0 %v2263_v21  ;;  %v2580_v21 = vld [vmem:[%s3328_s2 + $0x30] sm:$0xff]  }
  0x42   :  { %3355 = vst [vmem:[#allocation5_spill] sm:$0xff] %v2580_v21 }
  0x48   :  { %2023 = vmatmul.mubr.bf16.gmra.mxu0 %v2250_v15  ;;  %v2551_v15 = vld [vmem:[%s3328_s2 + $0x8] sm:$0xff]  }
  0xf0   :  { %v2012_v22 = vpop.f32.mrf.mxu0 }
  0xf1   :  { %v227_v4 = vadd.f32 %v2012_v22, %v1806_v35  ;;  %v2587_v22 = vld [vmem:[%s3328_s2 + $0x38] sm:$0xff]  }
  0xf2   :  { %v218_v23 = vpop.f32.mrf.mxu0  ;;  %3356 = vst [vmem:[#allocation6_spill] sm:$0xff] %v2587_v22 }
  0xf3   :  { %v2538_v9 = vmax.f32 %v227_v4, 0.0  ;;  %v219_v10 = vadd.f32 %v1806_v35, %v218_v23  ;;  %v2264_v23 = vld [vmem:[%s3331_s5 + $0x10] sm:$0xff]  }
  0xf4   :  { %v2013_v24 = vpop.f32.mrf.mxu0  ;;  %2068 = vmatprep.subr.bf16.mxu0 %v2264_v23 }
  0xf5   :  { %v230_v1 = vadd.f32 %v2013_v24, %v1806_v35  ;;  %v2544_v13 = vmax.f32 %v219_v10, 0.0  ;;  %2069 = vmatpush3.bf16.msra.mxu0 %v2264_v23  ;;  %v2265_v24 = vld [vmem:[%s3331_s5 + $0x8] sm:$0xff]  }
  0xf6   :  { %v221_v25 = vpop.f32.mrf.mxu0  ;;  %2070 = vmatprep.subr.bf16.mxu0 %v2265_v24 }
  0xf7   :  { %v2534_v6 = vmax.f32 %v230_v1, 0.0  ;;  %v222_v7 = vadd.f32 %v1806_v35, %v221_v25  ;;  %v2266_v25 = vld [vmem:[%s3331_s5] sm:$0xff]  }
  0xf8   :  { %v2016_v26 = vpop.f32.mrf.mxu0 }
  0xf9   :  { %v243_v58 = vadd.f32 %v2016_v26, %v1806_v35  ;;  %v2540_v11 = vmax.f32 %v222_v7, 0.0  ;;  %v315_v12 = vpack.c.bf16 %v2534_v6, %v2538_v9  ;;  %2071 = vmatpush3.bf16.msra.mxu0 %v2265_v24 }
  0xfa   :  { %v234_v27 = vpop.f32.mrf.mxu0  ;;  %2072 = vmatprep.subr.bf16.mxu0 %v2266_v25 }
  0xfb   :  { %v2526_v63 = vmax.f32 %v243_v58, 0.0  ;;  %v235_v0 = vadd.f32 %v1806_v35, %v234_v27  ;;  %v314_v14 = vpack.c.bf16 %v2540_v11, %v2544_v13 }
  0xfc   :  { %v2017_v28 = vpop.f32.mrf.mxu0 }
  0xfd   :  { %v246_v55 = vadd.f32 %v2017_v28, %v1806_v35  ;;  %v2532_v5 = vmax.f32 %v235_v0, 0.0  ;;  %2073 = vmatpush3.bf16.msra.mxu0 %v2266_v25  ;;  %v2638_v0 = vmul.f32 0.1, %v2526_v63 }
  0xfe   :  { %v237_v29 = vpop.f32.mrf.mxu0 }
  0xff   :  { %v2522_v60 = vmax.f32 %v246_v55, 0.0  ;;  %v238_v61 = vadd.f32 %v1806_v35, %v237_v29  ;;  %v2632_v58 = vmul.f32 0.1, %v2532_v5  ;;  %3364 = vst [vmem:[#allocation14_spill] sm:$0xff] %v2638_v0 }
 0x100   :  { %v2020_v30 = vpop.f32.mrf.mxu0 }
 0x101   :  { %v259_v46 = vadd.f32 %v2020_v30, %v1806_v35  ;;  %v2528_v2 = vmax.f32 %v238_v61, 0.0  ;;  %v317_v3 = vpack.c.bf16 %v2522_v60, %v2526_v63  ;;  %v2629_v55 = vmul.f32 0.1, %v2522_v60  ;;  %3362 = vst [vmem:[#allocation12_spill] sm:$0xff] %v2632_v58 }
 0x102   :  { %v250_v31 = vpop.f32.mrf.mxu0 }
 0x103   :  { %v2514_v53 = vmax.f32 %v259_v46, 0.0  ;;  %v251_v54 = vadd.f32 %v1806_v35, %v250_v31  ;;  %v316_v8 = vpack.c.bf16 %v2528_v2, %v2532_v5  ;;  %v2601_v31 = vmul.f32 0.1, %v2534_v6  ;;  %3361 = vst [vmem:[#allocation11_spill] sm:$0xff] %v2629_v55 }
 0x104   :  { %v2021_v32 = vpop.f32.mrf.mxu0 }
 0x105   :  { %v262_v42 = vadd.f32 %v2021_v32, %v1806_v35  ;;  %v2520_v59 = vmax.f32 %v251_v54, 0.0  ;;  %3357 = vst [vmem:[#allocation7_spill] sm:$0xff] %v2601_v31 }
 0x106   :  { %v253_v33 = vpop.f32.mrf.mxu0 }
 0x107   :  { %v2510_v50 = vmax.f32 %v262_v42, 0.0  ;;  %v254_v51 = vadd.f32 %v1806_v35, %v253_v33  ;;  %v2604_v33 = vmul.f32 0.1, %v2544_v13 }
 0x108   :  { %v2024_v34 = vpop.f32.mrf.mxu0 }
 0x109   :  { %v275_v37 = vadd.f32 %v2024_v34, %v1806_v35  ;;  %v2516_v56 = vmax.f32 %v254_v51, 0.0  ;;  %v319_v57 = vpack.c.bf16 %v2510_v50, %v2514_v53  ;;  %3358 = vst [vmem:[#allocation8_spill] sm:$0xff] %v2604_v33 }
 0x10a   :  { %v266_v36 = vpop.f32.mrf.mxu0 }
 0x10b   :  { %v267_v39 = vadd.f32 %v1806_v35, %v266_v36  ;;  %v2500_v43 = vmax.f32 %v275_v37, 0.0  ;;  %v318_v62 = vpack.c.bf16 %v2516_v56, %v2520_v59  ;;  %v2610_v36 = vmul.f32 0.1, %v2538_v9 }
 0x10c   :  { %v2025_v38 = vpop.f32.mrf.mxu0 }
 0x10d   :  { %v278_v40 = vadd.f32 %v2025_v38, %v1806_v35  ;;  %v2504_v47 = vmax.f32 %v267_v39, 0.0  ;;  %3360 = vst [vmem:[#allocation10_spill] sm:$0xff] %v2610_v36 }
 0x10e   :  { %v269_v41 = vpop.f32.mrf.mxu0 }
 0x10f   :  { %v2502_v44 = vmax.f32 %v278_v40, 0.0  ;;  %v270_v45 = vadd.f32 %v1806_v35, %v269_v41  ;;  %v2607_v35 = vmul.f32 0.1, %v2540_v11 }
 0x111   :  { %v2506_v48 = vmax.f32 %v270_v45, 0.0  ;;  %v321_v49 = vpack.c.bf16 %v2502_v44, %v2500_v43  ;;  %3359 = vst [vmem:[#allocation9_spill] sm:$0xff] %v2607_v35 }
 0x113   :  { %2026 = vmatprep.subr.bf16.mxu1 %v321_v49  ;;  %v320_v52 = vpack.c.bf16 %v2506_v48, %v2504_v47 }
 0x114   :  { %2027 = vmatpush3.bf16.msra.mxu1 %v321_v49 }
 0x115   :  { %2028 = vmatprep.subr.bf16.mxu1 %v320_v52 }
 0x118   :  { %2029 = vmatpush3.bf16.msra.mxu1 %v320_v52 }
 0x119   :  { %2030 = vmatprep.subr.bf16.mxu1 %v319_v57 }
 0x11c   :  { %2031 = vmatpush3.bf16.msra.mxu1 %v319_v57 }
 0x11d   :  { %2032 = vmatprep.subr.bf16.mxu1 %v318_v62 }
 0x120   :  { %2033 = vmatpush3.bf16.msra.mxu1 %v318_v62  ;;  %v2635_v62 = vmul.f32 0.1, %v2528_v2 }
 0x121   :  { %2034 = vmatprep.subr.bf16.mxu1 %v317_v3 }
 0x122   :  { %3363 = vst [vmem:[#allocation13_spill] sm:$0xff] %v2635_v62 }
 0x124   :  { %2035 = vmatpush3.bf16.msra.mxu1 %v317_v3 }
 0x125   :  { %2036 = vmatprep.subr.bf16.mxu1 %v316_v8 }
 0x128   :  { %2037 = vmatpush3.bf16.msra.mxu1 %v316_v8 }
 0x129   :  { %2038 = vmatprep.subr.bf16.mxu1 %v315_v12 }
 0x12c   :  { %2039 = vmatpush3.bf16.msra.mxu1 %v315_v12 }
 0x12d   :  { %2040 = vmatprep.subr.bf16.mxu1 %v314_v14 }
 0x130   :  { %2041 = vmatpush3.bf16.msra.mxu1 %v314_v14 }
 0x133   :  { %2043 = vmatmul.mubr.bf16.vlgmr.msra.gmra.mxu1 %v2551_v15 }
 0x134   :  { %2046 = vmatprep.mubr.bf16.mxu1 %v2556_v17 }
 0x13b   :  { %2047 = vmatmul.mubr.bf16.gmra.mxu1 %v2563_v18 }
 0x13c   :  { %2050 = vmatprep.mubr.bf16.mxu1 %v2568_v19 }
 0x143   :  { %2051 = vmatmul.mubr.bf16.gmra.mxu1 %v2575_v20 }
 0x144   :  { %2054 = vmatprep.mubr.bf16.mxu1 %v2580_v21 }
 0x14b   :  { %2055 = vmatmul.mubr.bf16.gmra.mxu1 %v2587_v22 }
 0x14c   :  { %2106 = vmatprep.mubr.bf16.mxu1 %v2479_v16 }
 0x1f3   :  { %v2044_v26 = vpop.f32.mrf.mxu1 }
 0x1f4   :  { %v469_v30 = vmul.f32 0.9, %v2044_v26 }
 0x1f5   :  { %v404_v16 = vpop.f32.mrf.mxu1 }
 0x1f6   :  { %v467_v28 = vmul.f32 0.9, %v404_v16  ;;  %v2622_v41 = vadd.f32 %v2610_v36, %v469_v30  ;;  %v2657_v16 = vmul.f32 0.1, %v2510_v50  ;;  %v2663_v30 = vmul.f32 0.1, %v2516_v56 }
 0x1f7   :  { %v2045_v27 = vpop.f32.mrf.mxu1 }
 0x1f8   :  { %v470_v29 = vmul.f32 0.9, %v2045_v27  ;;  %v2616_v39 = vadd.f32 %v2604_v33, %v467_v28  ;;  %3365 = vst [vmem:[#allocation15_spill] sm:$0xff] %v2657_v16  ;;  %v2660_v28 = vmul.f32 0.1, %v2520_v59  ;;  %3367 = vst [vmem:[#allocation17_spill] sm:$0xff] %v2663_v30 }
 0x1f9   :  { %v407_v32 = vpop.f32.mrf.mxu1 }
 0x1fa   :  { %v468_v34 = vmul.f32 0.9, %v407_v32  ;;  %v2613_v37 = vadd.f32 %v2601_v31, %v470_v29  ;;  %3366 = vst [vmem:[#allocation16_spill] sm:$0xff] %v2660_v28  ;;  %v2666_v32 = vmul.f32 0.1, %v2514_v53 }
 0x1fb   :  { %v2048_v38 = vpop.f32.mrf.mxu1 }
 0x1fc   :  { %v2619_v40 = vadd.f32 %v2607_v35, %v468_v34  ;;  %v516_v46 = vpack.c.bf16 %v2613_v37, %v2622_v41  ;;  %v473_v54 = vmul.f32 0.9, %v2048_v38  ;;  %3368 = vst [vmem:[#allocation18_spill] sm:$0xff] %v2666_v32 }
 0x1fd   :  { %v420_v42 = vpop.f32.mrf.mxu1 }
 0x1fe   :  { %v515_v45 = vpack.c.bf16 %v2619_v40, %v2616_v39  ;;  %v471_v51 = vmul.f32 0.9, %v420_v42  ;;  %v2650_v8 = vadd.f32 %v2638_v0, %v473_v54 }
 0x1ff   :  { %v2049_v49 = vpop.f32.mrf.mxu1 }
 0x200   :  { %v474_v52 = vmul.f32 0.9, %v2049_v49  ;;  %2074 = vmatprep.mubr.bf16.mxu0 %v515_v45  ;;  %v2644_v4 = vadd.f32 %v2632_v58, %v471_v51 }
 0x201   :  { %v423_v57 = vpop.f32.mrf.mxu1  ;;  %2075 = vmatmul.mubr.bf16.vlgmr.msra.gmra.mxu0 %v516_v46 }
 0x202   :  { %v472_v61 = vmul.f32 0.9, %v423_v57  ;;  %v2641_v1 = vadd.f32 %v2629_v55, %v474_v52 }
 0x203   :  { %v2052_v3 = vpop.f32.mrf.mxu1 }
 0x204   :  { %v2647_v7 = vadd.f32 %v2635_v62, %v472_v61  ;;  %v518_v23 = vpack.c.bf16 %v2641_v1, %v2650_v8  ;;  %v477_v26 = vmul.f32 0.9, %v2052_v3 }
 0x205   :  { %v436_v10 = vpop.f32.mrf.mxu1 }
 0x206   :  { %v517_v12 = vpack.c.bf16 %v2647_v7, %v2644_v4  ;;  %v475_v24 = vmul.f32 0.9, %v436_v10  ;;  %v2678_v46 = vadd.f32 %v2666_v32, %v477_v26  ;;  %v2685_v10 = vmul.f32 0.1, %v2502_v44 }
 0x207   :  { %v2053_v14 = vpop.f32.mrf.mxu1  ;;  %v2730_v32 = vstv %s684_s23 }
 0x208   :  { %v478_v25 = vmul.f32 0.9, %v2053_v14  ;;  %2078 = vmatprep.mubr.bf16.mxu0 %v517_v12  ;;  %v2672_v42 = vadd.f32 %v2660_v28, %v475_v24  ;;  %3369 = vst [vmem:[#allocation19_spill] sm:$0xff] %v2685_v10  ;;  %v2688_v14 = vmul.f32 0.1, %v2504_v47  ;;  %v692_v36 = vmul.f32 %v2730_v32, %v2650_v8 }
 0x209   :  { %v439_v27 = vpop.f32.mrf.mxu1  ;;  %2079 = vmatmul.mubr.bf16.gmra.mxu0 %v518_v23  ;;  %v2691_v24 = vmul.f32 0.1, %v2506_v48 }
 0x20a   :  { %v476_v29 = vmul.f32 0.9, %v439_v27  ;;  %v2669_v34 = vadd.f32 %v2657_v16, %v478_v25  ;;  %3370 = vst [vmem:[#allocation20_spill] sm:$0xff] %v2688_v14  ;;  %v2694_v25 = vmul.f32 0.1, %v2500_v43 }
 0x20b   :  { %v2056_v38 = vpop.f32.mrf.mxu1  ;;  %3371 = vst [vmem:[#allocation21_spill] sm:$0xff] %v2691_v24 }
 0x20c   :  { %v2675_v45 = vadd.f32 %v2663_v30, %v476_v29  ;;  %v520_v54 = vpack.c.bf16 %v2669_v34, %v2678_v46  ;;  %v481_v3 = vmul.f32 0.9, %v2056_v38  ;;  %3372 = vst [vmem:[#allocation22_spill] sm:$0xff] %v2694_v25  ;;  %v697_v58 = vmul.f32 %v2730_v32, %v2669_v34 }
 0x20d   :  { %v452_v49 = vpop.f32.mrf.mxu1 }
 0x20e   :  { %v519_v51 = vpack.c.bf16 %v2675_v45, %v2672_v42  ;;  %v479_v57 = vmul.f32 0.9, %v452_v49  ;;  %v513_v38 = vadd.f32 %v2694_v25, %v481_v3  ;;  %v2271_v3 = vld [vmem:[%s3331_s5 + $0x58] sm:$0xff]  }
 0x20f   :  { %v2057_v52 = vpop.f32.mrf.mxu1 }
 0x210   :  { %v482_v61 = vmul.f32 0.9, %v2057_v52  ;;  %2082 = vmatprep.mubr.bf16.mxu0 %v519_v51  ;;  %v511_v27 = vadd.f32 %v2688_v14, %v479_v57  ;;  %v2267_v52 = vld [vmem:[%s3331_s5 + $0x78] sm:$0xff]   ;;  %v2269_v57 = vld [vmem:[%s3331_s5 + $0x68] sm:$0xff]   ;;  %v700_v16 = vmul.f32 %v2730_v32, %v513_v38 }
 0x211   :  { %v455_v12 = vpop.f32.mrf.mxu1  ;;  %2083 = vmatmul.mubr.bf16.gmra.mxu0 %v520_v54  ;;  %v2268_v54 = vld [vmem:[%s3331_s5 + $0x70] sm:$0xff]   ;;  %2122 = vmatprep.subr.bf16.mxu0 %v2267_v52 }
 0x212   :  { %v480_v23 = vmul.f32 0.9, %v455_v12  ;;  %v514_v26 = vadd.f32 %v2685_v10, %v482_v61  ;;  %2123 = vmatpush3.bf16.msra.mxu0 %v2267_v52  ;;  %v2270_v61 = vld [vmem:[%s3331_s5 + $0x60] sm:$0xff]   ;;  %v698_v33 = vmul.f32 %v2730_v32, %v511_v27 }
 0x213   :  { %2124 = vmatprep.subr.bf16.mxu0 %v2268_v54 }
 0x214   :  { %v2699_v29 = vadd.f32 %v2691_v24, %v480_v23  ;;  %v522_v51 = vpack.c.bf16 %v514_v26, %v513_v38  ;;  %v701_v8 = vmul.f32 %v2730_v32, %v514_v26 }
 0x216   :  { %v521_v49 = vpack.c.bf16 %v2699_v29, %v511_v27  ;;  %2125 = vmatpush3.bf16.msra.mxu0 %v2268_v54 }
 0x217   :  { %2126 = vmatprep.subr.bf16.mxu0 %v2269_v57 }
 0x218   :  { %2086 = vmatprep.mubr.bf16.mxu0 %v521_v49 }
 0x219   :  { %2087 = vmatmul.mubr.bf16.gmra.mxu0 %v522_v51 }
 0x21a   :  { %2127 = vmatpush3.bf16.msra.mxu0 %v2269_v57 }
 0x21b   :  { %2128 = vmatprep.subr.bf16.mxu0 %v2270_v61 }
 0x21e   :  { %2129 = vmatpush3.bf16.msra.mxu0 %v2270_v61 }
 0x21f   :  { %2130 = vmatprep.subr.bf16.mxu0 %v2271_v3 }
 0x222   :  { %2131 = vmatpush3.bf16.msra.mxu0 %v2271_v3  ;;  %v2728_v3 = vstv %s313_s22 }
 0x2c1   :  { %v2718_v12 = vpop.f32.mrf.mxu0 }
 0x2c3   :  { %v2720_v23 = vpop.f32.mrf.mxu0 }
 0x2c5   :  { %v2722_v49 = vpop.f32.mrf.mxu0 }
 0x2c7   :  { %v2724_v51 = vpop.f32.mrf.mxu0 }
 0x2c9   :  { %v2080_v52 = vpop.f32.mrf.mxu0 }
 0x2cb   :  { %v2726_v54 = vpop.f32.mrf.mxu0 }
 0x2cd   :  { %v2081_v57 = vpop.f32.mrf.mxu0 }
 0x2cf   :  { %v640_v25 = vpop.f32.mrf.mxu0 }
 0x2d1   :  { %v2084_v24 = vpop.f32.mrf.mxu0 }
 0x2d2   :  { %v713_v62 = vmul.f32 %v2084_v24, %v2728_v3 }
 0x2d3   :  { %v653_v14 = vpop.f32.mrf.mxu0 }
 0x2d4   :  { %v711_v27 = vmul.f32 %v2728_v3, %v653_v14 }
 0x2d5   :  { %v2085_v61 = vpop.f32.mrf.mxu0 }
 0x2d6   :  { %v714_v30 = vmul.f32 %v2085_v61, %v2728_v3  ;;  %v693_v61 = vmul.f32 %v2730_v32, %v2641_v1  ;;  %v695_v1 = vmul.f32 %v2730_v32, %v2675_v45  ;;  %v709_v45 = vmul.f32 %v2080_v52, %v2728_v3 }
 0x2d7   :  { %v656_v10 = vpop.f32.mrf.mxu0 }
 0x2d8   :  { %v730_v38 = vadd.f32 %v714_v30, %v697_v58  ;;  %v712_v24 = vmul.f32 %v2728_v3, %v656_v10 }
 0x2d9   :  { %v2088_v28 = vpop.f32.mrf.mxu0 }
 0x2da   :  { %v717_v0 = vmul.f32 %v2088_v28, %v2728_v3  ;;  %v696_v28 = vmul.f32 %v2730_v32, %v2678_v46 }
 0x2db   :  { %v669_v55 = vpop.f32.mrf.mxu0 }
 0x2dc   :  { %v733_v35 = vadd.f32 %v717_v0, %v700_v16  ;;  %v715_v31 = vmul.f32 %v2728_v3, %v669_v55  ;;  %v710_v16 = vmul.f32 %v2081_v57, %v2728_v3  ;;  %v729_v55 = vadd.f32 %v713_v62, %v696_v28 }
 0x2dd   :  { %v2089_v22 = vpop.f32.mrf.mxu0  ;;  %v728_v62 = vadd.f32 %v712_v24, %v695_v1  ;;  %v705_v1 = vmul.f32 %v2718_v12, %v2728_v3  ;;  %v704_v12 = vmul.f32 %v2728_v3, %v2724_v51 }
 0x2de   :  { %v749_v34 = vadd.f32 %v733_v35, %v2500_v43  ;;  %v731_v21 = vadd.f32 %v715_v31, %v698_v33  ;;  %v718_v0 = vmul.f32 %v2089_v22, %v2728_v3  ;;  %v699_v43 = vmul.f32 %v2730_v32, %v2699_v29 }
 0x2df   :  { %v672_v46 = vpop.f32.mrf.mxu0  ;;  %v691_v22 = vmul.f32 %v2730_v32, %v2647_v7  ;;  %v694_v33 = vmul.f32 %v2730_v32, %v2672_v42  ;;  %v746_v35 = vadd.f32 %v730_v38, %v2510_v50  ;;  %v726_v14 = vadd.f32 %v710_v16, %v693_v61 }
 0x2e0   :  { %v747_v58 = vadd.f32 %v731_v21, %v2504_v47  ;;  %v734_v30 = vadd.f32 %v718_v0, %v701_v8  ;;  %v716_v31 = vmul.f32 %v2728_v3, %v672_v46  ;;  %v781_v10 = vmul.f32 0.1, %v749_v34 }
 0x2e1   :  { %v745_v26 = vadd.f32 %v729_v55, %v2514_v53  ;;  %v727_v29 = vadd.f32 %v711_v27, %v694_v33  ;;  %vm765_vm0 = vcmp.gt.f32.partialorder %v749_v34, 0.0  ;;  %v708_v42 = vmul.f32 %v2728_v3, %v640_v25 }
 0x2e2   :  { %v750_v47 = vadd.f32 %v734_v30, %v2502_v44  ;;  %v732_v21 = vadd.f32 %v716_v31, %v699_v43  ;;  %v779_v57 = vmul.f32 0.1, %v747_v58  ;;  %v778_v50 = vmul.f32 0.1, %v746_v35 }
 0x2e3   :  { %v744_v38 = vadd.f32 %v728_v62, %v2516_v56  ;;  %vm763_vm2 = vcmp.gt.f32.partialorder %v747_v58, 0.0  ;;  %v2769_v24 = vsel %vm765_vm0, %v749_v34, %v781_v10  ;;  %v725_v53 = vadd.f32 %v709_v45, %v692_v36 }
 0x2e4   :  { %v782_v28 = vmul.f32 0.1, %v750_v47  ;;  %v748_v7 = vadd.f32 %v732_v21, %v2506_v48  ;;  %vm766_vm1 = vcmp.gt.f32.partialorder %v750_v47, 0.0  ;;  %v707_v61 = vmul.f32 %v2728_v3, %v2726_v54 }
 0x2e5   :  { %vm762_vm4 = vcmp.gt.f32.partialorder %v746_v35, 0.0  ;;  %v777_v8 = vmul.f32 0.1, %v745_v26  ;;  %v743_v25 = vadd.f32 %v727_v29, %v2520_v59  ;;  %v2778_v0 = vsel %vm763_vm2, %v747_v58, %v779_v57 }
 0x2e6   :  { %v780_v52 = vmul.f32 0.1, %v748_v7  ;;  %v2771_v44 = vsel %vm766_vm1, %v750_v47, %v782_v28  ;;  %vm764_vm3 = vcmp.gt.f32.partialorder %v748_v7, 0.0  ;;  %v706_v34 = vmul.f32 %v2722_v49, %v2728_v3 }
 0x2e7   :  { %v807_v48 = vpack.c.bf16 %v2771_v44, %v2769_v24  ;;  %v690_v36 = vmul.f32 %v2730_v32, %v2644_v4  ;;  %vm761_vm5 = vcmp.gt.f32.partialorder %v745_v26, 0.0  ;;  %v742_v16 = vadd.f32 %v726_v14, %v2522_v60 }
 0x2e8   :  { %v2780_v56 = vsel %vm764_vm3, %v748_v7, %v780_v52  ;;  %v724_v55 = vadd.f32 %v708_v42, %v691_v22  ;;  %v776_v27 = vmul.f32 0.1, %v744_v38  ;;  %v2789_v59 = vsel %vm762_vm4, %v746_v35, %v778_v50 }
 0x2e9   :  { %2090 = vmatprep.subr.bf16.mxu1 %v807_v48  ;;  %v806_v54 = vpack.c.bf16 %v2780_v56, %v2778_v0  ;;  %v689_v49 = vmul.f32 %v2730_v32, %v2613_v37  ;;  %vm760_vm6 = vcmp.gt.f32.partialorder %v744_v38, 0.0  ;;  %v741_v4 = vadd.f32 %v725_v53, %v2526_v63 }
 0x2ea   :  { %2091 = vmatpush3.bf16.msra.mxu1 %v807_v48  ;;  %v723_v46 = vadd.f32 %v707_v61, %v690_v36  ;;  %v775_v58 = vmul.f32 0.1, %v743_v25  ;;  %v2796_v30 = vsel %vm761_vm5, %v745_v26, %v777_v8  ;;  %v688_v60 = vmul.f32 %v2730_v32, %v2622_v41  ;;  %v3373_v48 = vld [vmem:[#allocation5_spill] sm:$0xff]  ;;  %v3374_v8 = vld [vmem:[#allocation6_spill] sm:$0xff] }
 0x2eb   :  { %2092 = vmatprep.subr.bf16.mxu1 %v806_v54  ;;  %v722_v43 = vadd.f32 %v706_v34, %v689_v49  ;;  %v805_v31 = vpack.c.bf16 %v2789_v59, %v2796_v30  ;;  %vm759_vm7 = vcmp.gt.f32.partialorder %v743_v25, 0.0  ;;  %v774_v37 = vmul.f32 0.1, %v742_v16  ;;  %v2278_v34 = vld [vmem:[%s3332_s6 + $0x20] sm:$0xff]  }
 0x2ec   :  { %v740_v22 = vadd.f32 %v724_v55, %v2528_v2  ;;  %v2805_v63 = vsel %vm760_vm6, %v744_v38, %v776_v27  ;;  %v721_v33 = vadd.f32 %v705_v1, %v688_v60  ;;  %v687_v35 = vmul.f32 %v2730_v32, %v2619_v40 }
 0x2ed   :  { %vm758_vm8 = vcmp.gt.f32.partialorder %v742_v16, 0.0  ;;  %v703_v41 = vmul.f32 %v2728_v3, %v2720_v23  ;;  %v773_v62 = vmul.f32 0.1, %v741_v4  ;;  %v739_v45 = vadd.f32 %v723_v46, %v2532_v5  ;;  %v3375_v46 = vld [vmem:[#allocation7_spill] sm:$0xff] }
 0x2ee   :  { %2093 = vmatpush3.bf16.msra.mxu1 %v806_v54  ;;  %v2812_v10 = vsel %vm759_vm7, %v743_v25, %v775_v58  ;;  %v686_v2 = vmul.f32 %v2730_v32, %v2616_v39  ;;  %vm757_vm9 = vcmp.gt.f32.partialorder %v741_v4, 0.0  ;;  %v738_v47 = vadd.f32 %v722_v43, %v2534_v6  ;;  %v2272_v25 = vld [vmem:[%s3331_s5 + $0x50] sm:$0xff]   ;;  %v3376_v43 = vld [vmem:[#allocation8_spill] sm:$0xff] }
 0x2ef   :  { %2094 = vmatprep.subr.bf16.mxu1 %v805_v31  ;;  %v804_v51 = vpack.c.bf16 %v2805_v63, %v2812_v10  ;;  %v720_v40 = vadd.f32 %v704_v12, %v687_v35  ;;  %v772_v21 = vmul.f32 0.1, %v740_v22  ;;  %v2819_v14 = vsel %vm758_vm8, %v742_v16, %v774_v37  ;;  %2132 = vmatprep.subr.bf16.mxu0 %v2272_v25  ;;  %v3377_v12 = vld [vmem:[#allocation9_spill] sm:$0xff] }
 0x2f0   :  { %vm756_vm10 = vcmp.gt.f32.partialorder %v740_v22, 0.0  ;;  %v737_v5 = vadd.f32 %v721_v33, %v2538_v9  ;;  %v719_v23 = vadd.f32 %v703_v41, %v686_v2  ;;  %v771_v3 = vmul.f32 0.1, %v739_v45  ;;  %2133 = vmatpush3.bf16.msra.mxu0 %v2272_v25 }
 0x2f1   :  { %v2822_v26 = vsel %vm757_vm9, %v741_v4, %v773_v62  ;;  %vm755_vm11 = vcmp.gt.f32.partialorder %v739_v45, 0.0  ;;  %v770_v32 = vmul.f32 0.1, %v738_v47  ;;  %v736_v6 = vadd.f32 %v720_v40, %v2540_v11 }
 0x2f2   :  { %2095 = vmatpush3.bf16.msra.mxu1 %v805_v31  ;;  %v803_v39 = vpack.c.bf16 %v2819_v14, %v2822_v26  ;;  %v2827_v29 = vsel %vm756_vm10, %v740_v22, %v772_v21  ;;  %vm754_vm12 = vcmp.gt.f32.partialorder %v738_v47, 0.0  ;;  %v769_v57 = vmul.f32 0.1, %v737_v5  ;;  %v3378_v22 = vld [vmem:[#allocation10_spill] sm:$0xff] }
 0x2f3   :  { %2096 = vmatprep.subr.bf16.mxu1 %v804_v51  ;;  %v735_v28 = vadd.f32 %v719_v23, %v2544_v13  ;;  %v2830_v9 = vsel %vm755_vm11, %v739_v45, %v771_v3  ;;  %vm753_vm13 = vcmp.gt.f32.partialorder %v737_v5, 0.0  ;;  %v768_v42 = vmul.f32 0.1, %v736_v6 }
 0x2f4   :  { %v802_v7 = vpack.c.bf16 %v2827_v29, %v2830_v9  ;;  %v2834_v50 = vsel %vm754_vm12, %v738_v47, %v770_v32  ;;  %vm752_vm14 = vcmp.gt.f32.partialorder %v736_v6, 0.0  ;;  %v2836_v38 = vsel %vm753_vm13, %v737_v5, %v769_v57  ;;  %v3379_v5 = vld [vmem:[#allocation11_spill] sm:$0xff] }
 0x2f5   :  { %v767_v11 = vmul.f32 0.1, %v735_v28  ;;  %v801_v52 = vpack.c.bf16 %v2834_v50, %v2836_v38  ;;  %vm751_vm15 = vcmp.gt.f32.partialorder %v735_v28, 0.0  ;;  %v2840_v13 = vsel %vm752_vm14, %v736_v6, %v768_v42  ;;  %v3381_v6 = vld [vmem:[#allocation13_spill] sm:$0xff] }
 0x2f6   :  { %2097 = vmatpush3.bf16.msra.mxu1 %v804_v51 }
 0x2f7   :  { %2098 = vmatprep.subr.bf16.mxu1 %v803_v39  ;;  %v2842_v53 = vsel %vm751_vm15, %v735_v28, %v767_v11  ;;  %v3382_v28 = vld [vmem:[#allocation14_spill] sm:$0xff] }
 0x2f8   :  { %v800_v61 = vpack.c.bf16 %v2840_v13, %v2842_v53 }
 0x2fa   :  { %2099 = vmatpush3.bf16.msra.mxu1 %v803_v39  ;;  %v3380_v39 = vld [vmem:[#allocation12_spill] sm:$0xff] }
 0x2fb   :  { %2100 = vmatprep.subr.bf16.mxu1 %v802_v7 }
 0x2fe   :  { %2101 = vmatpush3.bf16.msra.mxu1 %v802_v7 }
 0x2ff   :  { %2102 = vmatprep.subr.bf16.mxu1 %v801_v52 }
 0x302   :  { %2103 = vmatpush3.bf16.msra.mxu1 %v801_v52 }
 0x303   :  { %2104 = vmatprep.subr.bf16.mxu1 %v800_v61 }
 0x306   :  { %2105 = vmatpush3.bf16.msra.mxu1 %v800_v61 }
 0x309   :  { %2107 = vmatmul.mubr.bf16.vlgmr.msra.gmra.mxu1 %v2551_v15  ;;  %v2273_v15 = vld [vmem:[%s3331_s5 + $0x48] sm:$0xff]  }
 0x30a   :  { %2110 = vmatprep.mubr.bf16.mxu1 %v2556_v17  ;;  %2134 = vmatprep.subr.bf16.mxu0 %v2273_v15  ;;  %v2274_v17 = vld [vmem:[%s3331_s5 + $0x40] sm:$0xff]  }
 0x30b   :  { %2135 = vmatpush3.bf16.msra.mxu0 %v2273_v15 }
 0x30c   :  { %2136 = vmatprep.subr.bf16.mxu0 %v2274_v17 }
 0x30f   :  { %2137 = vmatpush3.bf16.msra.mxu0 %v2274_v17 }
 0x311   :  { %2111 = vmatmul.mubr.bf16.gmra.mxu1 %v2563_v18  ;;  %v2275_v18 = vld [vmem:[%s3332_s6 + $0x38] sm:$0xff]  }
 0x312   :  { %2114 = vmatprep.mubr.bf16.mxu1 %v2568_v19  ;;  %v2276_v19 = vld [vmem:[%s3332_s6 + $0x30] sm:$0xff]   ;;  %2154 = vmatprep.subr.bf16.mxu1 %v2275_v18 }
 0x313   :  { %2155 = vmatpush3.bf16.msra.mxu1 %v2275_v18  ;;  %v3383_v18 = vld [vmem:[#allocation15_spill] sm:$0xff] }
 0x314   :  { %2156 = vmatprep.subr.bf16.mxu1 %v2276_v19 }
 0x317   :  { %2157 = vmatpush3.bf16.msra.mxu1 %v2276_v19 }
 0x319   :  { %2115 = vmatmul.mubr.bf16.gmra.mxu1 %v2575_v20  ;;  %v2277_v20 = vld [vmem:[%s3332_s6 + $0x28] sm:$0xff]  }
 0x31a   :  { %2118 = vmatprep.mubr.bf16.mxu1 %v3373_v48  ;;  %2158 = vmatprep.subr.bf16.mxu1 %v2277_v20 }
 0x31b   :  { %2159 = vmatpush3.bf16.msra.mxu1 %v2277_v20 }
 0x31c   :  { %2160 = vmatprep.subr.bf16.mxu1 %v2278_v34 }
 0x31f   :  { %2161 = vmatpush3.bf16.msra.mxu1 %v2278_v34  ;;  %v3384_v34 = vld [vmem:[#allocation16_spill] sm:$0xff] }
 0x321   :  { %2119 = vmatmul.mubr.bf16.gmra.mxu1 %v3374_v8 }
 0x3c9   :  { %v2108_v36 = vpop.f32.mrf.mxu1 }
 0x3ca   :  { %v907_v1 = vmul.f32 0.9, %v2108_v36 }
 0x3cb   :  { %v842_v54 = vpop.f32.mrf.mxu1 }
 0x3cc   :  { %v905_v55 = vmul.f32 0.9, %v842_v54  ;;  %v2884_v33 = vadd.f32 %v907_v1, %v3378_v22  ;;  %v3385_v54 = vld [vmem:[#allocation17_spill] sm:$0xff] }
 0x3cd   :  { %v2109_v16 = vpop.f32.mrf.mxu1 }
 0x3ce   :  { %v908_v27 = vmul.f32 0.9, %v2109_v16  ;;  %v2878_v31 = vadd.f32 %v905_v55, %v3376_v43  ;;  %v3386_v55 = vld [vmem:[#allocation18_spill] sm:$0xff] }
 0x3cf   :  { %v845_v49 = vpop.f32.mrf.mxu1 }
 0x3d0   :  { %v906_v4 = vmul.f32 0.9, %v845_v49  ;;  %v2875_v58 = vadd.f32 %v908_v27, %v3375_v46 }
 0x3d1   :  { %v2112_v60 = vpop.f32.mrf.mxu1 }
 0x3d2   :  { %v2881_v37 = vadd.f32 %v906_v4, %v3377_v12  ;;  %v938_v62 = vpack.c.bf16 %v2875_v58, %v2884_v33  ;;  %v911_v47 = vmul.f32 0.9, %v2112_v60 }
 0x3d3   :  { %v858_v35 = vpop.f32.mrf.mxu1 }
 0x3d4   :  { %v937_v41 = vpack.c.bf16 %v2881_v37, %v2878_v31  ;;  %v909_v2 = vmul.f32 0.9, %v858_v35  ;;  %v2900_v7 = vadd.f32 %v911_v47, %v3382_v28  ;;  %v2281_v28 = vld [vmem:[%s3332_s6 + $0x8] sm:$0xff]  }
 0x3d5   :  { %v2113_v45 = vpop.f32.mrf.mxu1 }
 0x3d6   :  { %v912_v51 = vmul.f32 0.9, %v2113_v45  ;;  %2138 = vmatprep.mubr.bf16.mxu0 %v937_v41  ;;  %v2894_v32 = vadd.f32 %v909_v2, %v3380_v39  ;;  %v3387_v41 = vld [vmem:[#allocation19_spill] sm:$0xff]  ;;  %v3388_v45 = vld [vmem:[#allocation20_spill] sm:$0xff] }
 0x3d7   :  { %v861_v40 = vpop.f32.mrf.mxu1  ;;  %2139 = vmatmul.mubr.bf16.vlgmr.msra.gmra.mxu0 %v938_v62  ;;  %v2279_v39 = vld [vmem:[%s3332_s6 + $0x18] sm:$0xff]  }
 0x3d8   :  { %v910_v21 = vmul.f32 0.9, %v861_v40  ;;  %v2891_v23 = vadd.f32 %v912_v51, %v3379_v5  ;;  %v3389_v51 = vld [vmem:[#allocation21_spill] sm:$0xff]  ;;  %v3390_v40 = vld [vmem:[#allocation22_spill] sm:$0xff]  ;;  %2162 = vmatprep.subr.bf16.mxu1 %v2279_v39 }
 0x3d9   :  { %v2116_v3 = vpop.f32.mrf.mxu1  ;;  %2163 = vmatpush3.bf16.msra.mxu1 %v2279_v39 }
 0x3da   :  { %v2897_v57 = vadd.f32 %v910_v21, %v3381_v6  ;;  %v940_v61 = vpack.c.bf16 %v2891_v23, %v2900_v7  ;;  %v915_v25 = vmul.f32 0.9, %v2116_v3  ;;  %v2280_v6 = vld [vmem:[%s3332_s6 + $0x10] sm:$0xff]  }
 0x3db   :  { %v874_v42 = vpop.f32.mrf.mxu1  ;;  %2164 = vmatprep.subr.bf16.mxu1 %v2280_v6 }
 0x3dc   :  { %v939_v11 = vpack.c.bf16 %v2897_v57, %v2894_v32  ;;  %v913_v48 = vmul.f32 0.9, %v874_v42  ;;  %v2916_v27 = vadd.f32 %v915_v25, %v3386_v55  ;;  %v2282_v42 = vld [vmem:[%s3332_s6] sm:$0xff]   ;;  %v2981_v25 = vstv %s1107_s28 }
 0x3dd   :  { %v2117_v52 = vpop.f32.mrf.mxu1  ;;  %2165 = vmatpush3.bf16.msra.mxu1 %v2280_v6 }
 0x3de   :  { %v916_v8 = vmul.f32 0.9, %v2117_v52  ;;  %2142 = vmatprep.mubr.bf16.mxu0 %v939_v11  ;;  %v2910_v36 = vadd.f32 %v913_v48, %v3384_v34  ;;  %2166 = vmatprep.subr.bf16.mxu1 %v2281_v28  ;;  %v2953_v11 = vld [vmem:[%s3334_s8 + $0x38] sm:$0xff]   ;;  %v2958_v52 = vld [vmem:[%s3334_s8 + $0x30] sm:$0xff]   ;;  %v2974_v48 = vld [vmem:[%s3334_s8 + $0x20] sm:$0xff]   ;;  %v1109_v34 = vmul.f32 %v2981_v25, %v2878_v31 }
 0x3df   :  { %v877_v15 = vpop.f32.mrf.mxu1  ;;  %2143 = vmatmul.mubr.bf16.gmra.mxu0 %v940_v61  ;;  %2186 = vmatprep.subr.bf16.mxu0 %v2953_v11  ;;  %v2967_v61 = vld [vmem:[%s3334_s8 + $0x28] sm:$0xff]  }
 0x3e0   :  { %v914_v17 = vmul.f32 0.9, %v877_v15  ;;  %v2907_v19 = vadd.f32 %v916_v8, %v3383_v18  ;;  %2187 = vmatpush3.bf16.msra.mxu0 %v2953_v11  ;;  %v2979_v8 = vstv %s1839_s27  ;;  %v1111_v18 = vmul.f32 %v2981_v25, %v2884_v33 }
 0x3e1   :  { %v2120_v20 = vpop.f32.mrf.mxu1  ;;  %2167 = vmatpush3.bf16.msra.mxu1 %v2281_v28  ;;  %2188 = vmatprep.subr.bf16.mxu0 %v2958_v52  ;;  %v1110_v33 = vmul.f32 %v2981_v25, %v2881_v37 }
 0x3e2   :  { %v2913_v16 = vadd.f32 %v914_v17, %v3385_v54  ;;  %v942_v46 = vpack.c.bf16 %v2907_v19, %v2916_v27  ;;  %v919_v12 = vmul.f32 0.9, %v2120_v20  ;;  %2168 = vmatprep.subr.bf16.mxu1 %v2282_v42 }
 0x3e3   :  { %v890_v1 = vpop.f32.mrf.mxu1 }
 0x3e4   :  { %v941_v49 = vpack.c.bf16 %v2913_v16, %v2910_v36  ;;  %v917_v60 = vmul.f32 0.9, %v890_v1  ;;  %v2932_v21 = vadd.f32 %v919_v12, %v3390_v40  ;;  %2189 = vmatpush3.bf16.msra.mxu0 %v2958_v52  ;;  %v1115_v40 = vmul.f32 %v2981_v25, %v2900_v7 }
 0x3e5   :  { %v2121_v4 = vpop.f32.mrf.mxu1  ;;  %2169 = vmatpush3.bf16.msra.mxu1 %v2282_v42  ;;  %2190 = vmatprep.subr.bf16.mxu0 %v2967_v61 }
 0x3e6   :  { %v920_v43 = vmul.f32 0.9, %v2121_v4  ;;  %2146 = vmatprep.mubr.bf16.mxu0 %v941_v49  ;;  %v2926_v2 = vadd.f32 %v917_v60, %v3388_v45  ;;  %2218 = vmatprep.subr.bf16.mxu1 %v2953_v11  ;;  %v1112_v4 = vmul.f32 %v2981_v25, %v2875_v58 }
 0x3e7   :  { %v893_v22 = vpop.f32.mrf.mxu1  ;;  %2147 = vmatmul.mubr.bf16.gmra.mxu0 %v942_v46 }
 0x3e8   :  { %v918_v35 = vmul.f32 0.9, %v893_v22  ;;  %v2923_v62 = vadd.f32 %v920_v43, %v3387_v41  ;;  %2191 = vmatpush3.bf16.msra.mxu0 %v2967_v61 }
 0x3e9   :  { %2192 = vmatprep.subr.bf16.mxu0 %v2974_v48 }
 0x3ea   :  { %v2929_v47 = vadd.f32 %v918_v35, %v3389_v51  ;;  %v944_v3 = vpack.c.bf16 %v2923_v62, %v2932_v21 }
 0x3ec   :  { %v943_v5 = vpack.c.bf16 %v2929_v47, %v2926_v2  ;;  %2193 = vmatpush3.bf16.msra.mxu0 %v2974_v48 }
 0x3ee   :  { %2150 = vmatprep.mubr.bf16.mxu0 %v943_v5 }
 0x3ef   :  { %2151 = vmatmul.mubr.bf16.gmra.mxu0 %v944_v3 }
 0x497   :  { %v2140_v15 = vpop.f32.mrf.mxu0 }
 0x498   :  { %v1128_v17 = vmul.f32 %v2140_v15, %v2979_v8 }
 0x499   :  { %v1044_v20 = vpop.f32.mrf.mxu0 }
 0x49a   :  { %v1126_v54 = vmul.f32 %v2979_v8, %v1044_v20  ;;  %v1144_v55 = vadd.f32 %v1128_v17, %v1111_v18  ;;  %v1114_v18 = vmul.f32 %v2981_v25, %v2897_v57 }
 0x49b   :  { %v2141_v1 = vpop.f32.mrf.mxu0 }
 0x49c   :  { %v1142_v49 = vadd.f32 %v1126_v54, %v1109_v34  ;;  %v1129_v46 = vmul.f32 %v2141_v1, %v2979_v8  ;;  %v1160_v12 = vadd.f32 %v1144_v55, %v2836_v38  ;;  %v1113_v38 = vmul.f32 %v2981_v25, %v2894_v32 }
 0x49d   :  { %v1047_v60 = vpop.f32.mrf.mxu0 }
 0x49e   :  { %v1145_v43 = vadd.f32 %v1129_v46, %v1112_v4  ;;  %v1127_v22 = vmul.f32 %v2979_v8, %v1047_v60  ;;  %v1158_v35 = vadd.f32 %v1142_v49, %v2842_v53  ;;  %v1192_v37 = vmul.f32 0.1, %v1160_v12 }
 0x49f   :  { %v2144_v31 = vpop.f32.mrf.mxu0  ;;  %vm1176_vm3 = vcmp.gt.f32.partialorder %v1160_v12, 0.0 }
 0x4a0   :  { %v1161_v41 = vadd.f32 %v1145_v43, %v2834_v50  ;;  %v1143_v45 = vadd.f32 %v1127_v22, %v1110_v33  ;;  %v1132_v51 = vmul.f32 %v2144_v31, %v2979_v8  ;;  %v1116_v50 = vmul.f32 %v2981_v25, %v2891_v23 }
 0x4a1   :  { %v1060_v58 = vpop.f32.mrf.mxu0  ;;  %v1190_v53 = vmul.f32 0.1, %v1158_v35  ;;  %vm1174_vm1 = vcmp.gt.f32.partialorder %v1158_v35, 0.0  ;;  %v3019_v4 = vsel %vm1176_vm3, %v1160_v12, %v1192_v37 }
 0x4a2   :  { %v1130_v5 = vmul.f32 %v2979_v8, %v1060_v58  ;;  %v1193_v3 = vmul.f32 0.1, %v1161_v41  ;;  %v1159_v39 = vadd.f32 %v1143_v45, %v2840_v13  ;;  %vm1177_vm0 = vcmp.gt.f32.partialorder %v1161_v41, 0.0 }
 0x4a3   :  { %v2145_v6 = vpop.f32.mrf.mxu0  ;;  %v1148_v7 = vadd.f32 %v1132_v51, %v1115_v40  ;;  %v3017_v49 = vsel %vm1174_vm1, %v1158_v35, %v1190_v53 }
 0x4a4   :  { %v1146_v28 = vadd.f32 %v1130_v5, %v1113_v38  ;;  %v1133_v42 = vmul.f32 %v2145_v6, %v2979_v8  ;;  %v1191_v15 = vmul.f32 0.1, %v1159_v39  ;;  %vm1175_vm2 = vcmp.gt.f32.partialorder %v1159_v39, 0.0 }
 0x4a5   :  { %v1063_v17 = vpop.f32.mrf.mxu0  ;;  %v3011_v20 = vsel %vm1177_vm0, %v1161_v41, %v1193_v3  ;;  %v1164_v46 = vadd.f32 %v1148_v7, %v2822_v26  ;;  %v1119_v26 = vmul.f32 %v2981_v25, %v2916_v27  ;;  %v1120_v41 = vmul.f32 %v2981_v25, %v2907_v19 }
 0x4a6   :  { %v1149_v32 = vadd.f32 %v1133_v42, %v1116_v50  ;;  %v1131_v13 = vmul.f32 %v2979_v8, %v1063_v17  ;;  %v1162_v23 = vadd.f32 %v1146_v28, %v2830_v9  ;;  %v3014_v54 = vsel %vm1175_vm2, %v1159_v39, %v1191_v15 }
 0x4a7   :  { %v2148_v34 = vpop.f32.mrf.mxu0  ;;  %v1222_v43 = vpack.c.bf16 %v3014_v54, %v3017_v49  ;;  %v1223_v9 = vpack.c.bf16 %v3011_v20, %v3019_v4  ;;  %v1196_v58 = vmul.f32 0.1, %v1164_v46  ;;  %v1118_v27 = vmul.f32 %v2981_v25, %v2913_v16 }
 0x4a8   :  { %v1165_v55 = vadd.f32 %v1149_v32, %v2819_v14  ;;  %v1147_v1 = vadd.f32 %v1131_v13, %v1114_v18  ;;  %v1136_v57 = vmul.f32 %v2148_v34, %v2979_v8  ;;  %v1117_v14 = vmul.f32 %v2981_v25, %v2910_v36 }
 0x4a9   :  { %v1076_v60 = vpop.f32.mrf.mxu0  ;;  %v1194_v12 = vmul.f32 0.1, %v1162_v23  ;;  %2170 = vmatprep.mubr.bf16.mxu1 %v1222_v43  ;;  %vm1178_vm5 = vcmp.gt.f32.partialorder %v1162_v23, 0.0  ;;  %vm1180_vm7 = vcmp.gt.f32.partialorder %v1164_v46, 0.0  ;;  %v1121_v7 = vmul.f32 %v2981_v25, %v2926_v2 }
 0x4aa   :  { %v1163_v33 = vadd.f32 %v1147_v1, %v2827_v29  ;;  %v1134_v22 = vmul.f32 %v2979_v8, %v1076_v60  ;;  %v1197_v31 = vmul.f32 0.1, %v1165_v55  ;;  %2171 = vmatmul.mubr.bf16.vlgmr.msra.gmra.mxu1 %v1223_v9  ;;  %vm1181_vm4 = vcmp.gt.f32.partialorder %v1165_v55, 0.0 }
 0x4ab   :  { %v2149_v35 = vpop.f32.mrf.mxu0  ;;  %v1152_v36 = vadd.f32 %v1136_v57, %v1119_v26  ;;  %2226 = vmatpush3.bf16.msra.mxu1 %v2953_v11  ;;  %v1123_v11 = vmul.f32 %v2981_v25, %v2932_v21  ;;  %v3049_v53 = vsel %vm1178_vm5, %v1162_v23, %v1194_v12  ;;  %v3055_v15 = vsel %vm1180_vm7, %v1164_v46, %v1196_v58  ;;  %v2290_v58 = vld [vmem:[%s3334_s8] sm:$0xff]  }
 0x4ac   :  { %v1195_v45 = vmul.f32 0.1, %v1163_v33  ;;  %v1150_v51 = vadd.f32 %v1134_v22, %v1117_v14  ;;  %v1137_v29 = vmul.f32 %v2149_v35, %v2979_v8  ;;  %vm1179_vm6 = vcmp.gt.f32.partialorder %v1163_v33, 0.0  ;;  %2219 = vmatprep.subr.bf16.mxu1 %v2958_v52 }
 0x4ad   :  { %v1079_v40 = vpop.f32.mrf.mxu0  ;;  %v3044_v39 = vsel %vm1181_vm4, %v1165_v55, %v1197_v31  ;;  %v1168_v16 = vadd.f32 %v1152_v36, %v2796_v30  ;;  %v1124_v13 = vmul.f32 %v2981_v25, %v2923_v62  ;;  %v1122_v1 = vmul.f32 %v2981_v25, %v2929_v47 }
 0x4ae   :  { %v1153_v38 = vadd.f32 %v1137_v29, %v1120_v41  ;;  %v1135_v5 = vmul.f32 %v2979_v8, %v1079_v40  ;;  %v1166_v19 = vadd.f32 %v1150_v51, %v2812_v10  ;;  %v3042_v3 = vsel %vm1179_vm6, %v1163_v33, %v1195_v45  ;;  %v2287_v45 = vld [vmem:[%s3334_s8 + $0x18] sm:$0xff]   ;;  %v2288_v51 = vld [vmem:[%s3334_s8 + $0x10] sm:$0xff]   ;;  %v2289_v29 = vld [vmem:[%s3334_s8 + $0x8] sm:$0xff]  }
 0x4af   :  { %v2152_v37 = vpop.f32.mrf.mxu0  ;;  %v1224_v10 = vpack.c.bf16 %v3042_v3, %v3049_v53  ;;  %2227 = vmatpush3.bf16.msra.mxu1 %v2958_v52  ;;  %v1225_v30 = vpack.c.bf16 %v3044_v39, %v3055_v15  ;;  %v1200_v23 = vmul.f32 0.1, %v1168_v16  ;;  %vm1184_vm11 = vcmp.gt.f32.partialorder %v1168_v16, 0.0  ;;  %2194 = vmatprep.subr.bf16.mxu0 %v2287_v45  ;;  %v3118_v40 = vld [vmem:[%s3333_s7] ss:$0 sm:$0xff] }
 0x4b0   :  { %v1169_v6 = vadd.f32 %v1153_v38, %v2789_v59  ;;  %v1151_v50 = vadd.f32 %v1135_v5, %v1118_v27  ;;  %v1140_v28 = vmul.f32 %v2152_v37, %v2979_v8  ;;  %2220 = vmatprep.subr.bf16.mxu1 %v2967_v61  ;;  %v1198_v17 = vmul.f32 0.1, %v1166_v19  ;;  %2195 = vmatpush3.bf16.msra.mxu0 %v2287_v45 }
 0x4b1   :  { %v1092_v42 = vpop.f32.mrf.mxu0  ;;  %2174 = vmatprep.mubr.bf16.mxu1 %v1224_v10  ;;  %vm1182_vm8 = vcmp.gt.f32.partialorder %v1166_v19, 0.0  ;;  %v3085_v33 = vsel %vm1184_vm11, %v1168_v16, %v1200_v23  ;;  %2196 = vmatprep.subr.bf16.mxu0 %v2288_v51 }
 0x4b2   :  { %v1167_v59 = vadd.f32 %v1151_v50, %v2805_v63  ;;  %v1138_v21 = vmul.f32 %v2979_v8, %v1092_v42  ;;  %v1201_v32 = vmul.f32 0.1, %v1169_v6  ;;  %2175 = vmatmul.mubr.bf16.gmra.mxu1 %v1225_v30  ;;  %vm1185_vm9 = vcmp.gt.f32.partialorder %v1169_v6, 0.0 }
 0x4b3   :  { %v2153_v18 = vpop.f32.mrf.mxu0  ;;  %v1156_v34 = vadd.f32 %v1140_v28, %v1123_v11  ;;  %2228 = vmatpush3.bf16.msra.mxu1 %v2967_v61  ;;  %v3075_v60 = vsel %vm1182_vm8, %v1166_v19, %v1198_v17 }
 0x4b4   :  { %v1199_v52 = vmul.f32 0.1, %v1167_v59  ;;  %v1154_v63 = vadd.f32 %v1138_v21, %v1121_v7  ;;  %v1141_v2 = vmul.f32 %v2153_v18, %v2979_v8  ;;  %vm1183_vm10 = vcmp.gt.f32.partialorder %v1167_v59, 0.0  ;;  %2221 = vmatprep.subr.bf16.mxu1 %v2974_v48  ;;  %2197 = vmatpush3.bf16.msra.mxu0 %v2288_v51 }
 0x4b5   :  { %v1095_v55 = vpop.f32.mrf.mxu0  ;;  %v3079_v9 = vsel %vm1185_vm9, %v1169_v6, %v1201_v32  ;;  %2198 = vmatprep.subr.bf16.mxu0 %v2289_v29 }
 0x4b6   :  { %v1170_v46 = vadd.f32 %v1154_v63, %v2778_v0  ;;  %v1157_v57 = vadd.f32 %v1141_v2, %v1124_v13  ;;  %v1139_v62 = vmul.f32 %v2979_v8, %v1095_v55  ;;  %v3077_v43 = vsel %vm1183_vm10, %v1167_v59, %v1199_v52 }
 0x4b7   :  { %v1226_v61 = vpack.c.bf16 %v3077_v43, %v3075_v60  ;;  %v1172_v0 = vadd.f32 %v1156_v34, %v2769_v24  ;;  %2229 = vmatpush3.bf16.msra.mxu1 %v2974_v48  ;;  %v1227_v22 = vpack.c.bf16 %v3079_v9, %v3085_v33 }
 0x4b8   :  { %v1173_v47 = vadd.f32 %v1157_v57, %v2771_v44  ;;  %v1155_v25 = vadd.f32 %v1139_v62, %v1122_v1  ;;  %v1202_v8 = vmul.f32 0.1, %v1170_v46  ;;  %vm1186_vm12 = vcmp.gt.f32.partialorder %v1170_v46, 0.0  ;;  %2222 = vmatprep.subr.bf16.mxu1 %v2287_v45  ;;  %2199 = vmatpush3.bf16.msra.mxu0 %v2289_v29 }
 0x4b9   :  { %2178 = vmatprep.mubr.bf16.mxu1 %v1226_v61  ;;  %v1204_v31 = vmul.f32 0.1, %v1172_v0  ;;  %vm1188_vm15 = vcmp.gt.f32.partialorder %v1172_v0, 0.0  ;;  %2200 = vmatprep.subr.bf16.mxu0 %v2290_v58 }
 0x4ba   :  { %v1171_v14 = vadd.f32 %v1155_v25, %v2780_v56  ;;  %v1205_v12 = vmul.f32 0.1, %v1173_v47  ;;  %2179 = vmatmul.mubr.bf16.gmra.mxu1 %v1227_v22  ;;  %vm1189_vm14 = vcmp.gt.f32.partialorder %v1173_v47, 0.0  ;;  %v3091_v26 = vsel %vm1186_vm12, %v1170_v46, %v1202_v8 }
 0x4bb   :  { %v3099_v35 = vsel %vm1188_vm15, %v1172_v0, %v1204_v31  ;;  %2230 = vmatpush3.bf16.msra.mxu1 %v2287_v45 }
 0x4bc   :  { %v1203_v44 = vmul.f32 0.1, %v1171_v14  ;;  %vm1187_vm13 = vcmp.gt.f32.partialorder %v1171_v14, 0.0  ;;  %v3097_v56 = vsel %vm1189_vm14, %v1173_v47, %v1205_v12  ;;  %2223 = vmatprep.subr.bf16.mxu1 %v2288_v51  ;;  %2201 = vmatpush3.bf16.msra.mxu0 %v2290_v58 }
 0x4bd   :  { %v1229_v41 = vpack.c.bf16 %v3097_v56, %v3099_v35 }
 0x4be   :  { %v3093_v24 = vsel %vm1187_vm13, %v1171_v14, %v1203_v44 }
 0x4bf   :  { %v1228_v48 = vpack.c.bf16 %v3093_v24, %v3091_v26  ;;  %2231 = vmatpush3.bf16.msra.mxu1 %v2288_v51 }
 0x4c0   :  { %2224 = vmatprep.subr.bf16.mxu1 %v2289_v29 }
 0x4c1   :  { %2182 = vmatprep.mubr.bf16.mxu1 %v1228_v48 }
 0x4c2   :  { %2183 = vmatmul.mubr.bf16.gmra.mxu1 %v1229_v41 }
 0x4c3   :  { %2232 = vmatpush3.bf16.msra.mxu1 %v2289_v29 }
 0x4c4   :  { %2225 = vmatprep.subr.bf16.mxu1 %v2290_v58 }
 0x4c7   :  { %2233 = vmatpush3.bf16.msra.mxu1 %v2290_v58 }
 0x56a   :  { %v2172_v36 = vpop.f32.mrf.mxu1 }
 0x56b   :  { %v1344_v5 = vadd.f32 %v2172_v36, %v3118_v40 }
 0x56c   :  { %v1335_v38 = vpop.f32.mrf.mxu1 }
 0x56d   :  { %v1336_v27 = vadd.f32 %v3118_v40, %v1335_v38  ;;  %v1400_v28 = vmax.f32 %v1344_v5, 0.0 }
 0x56e   :  { %v2173_v19 = vpop.f32.mrf.mxu1 }
 0x56f   :  { %v1347_v37 = vadd.f32 %v2173_v19, %v3118_v40  ;;  %v1398_v50 = vmax.f32 %v1336_v27, 0.0  ;;  %v1416_v32 = vadd.f32 %v1400_v28, %v3019_v4 }
 0x570   :  { %v1338_v6 = vpop.f32.mrf.mxu1 }
 0x571   :  { %v1401_v11 = vmax.f32 %v1347_v37, 0.0  ;;  %v1339_v16 = vadd.f32 %v3118_v40, %v1338_v6  ;;  %v1414_v21 = vadd.f32 %v1398_v50, %v3017_v49 }
 0x572   :  { %v2176_v42 = vpop.f32.mrf.mxu1 }
 0x573   :  { %v1399_v10 = vmax.f32 %v1339_v16, 0.0  ;;  %v1417_v59 = vadd.f32 %v1401_v11, %v3011_v20  ;;  %v1360_v18 = vadd.f32 %v2176_v42, %v3118_v40 }
 0x574   :  { %v1351_v7 = vpop.f32.mrf.mxu1 }
 0x575   :  { %v1415_v30 = vadd.f32 %v1399_v10, %v3014_v54  ;;  %v1352_v17 = vadd.f32 %v3118_v40, %v1351_v7  ;;  %v1431_v2 = vpack.c.bf16 %v1417_v59, %v1416_v32  ;;  %v1404_v49 = vmax.f32 %v1360_v18, 0.0 }
 0x576   :  { %v2177_v13 = vpop.f32.mrf.mxu1  ;;  %v1606_v59 = vlaneseq }
 0x577   :  { %v1363_v52 = vadd.f32 %v2177_v13, %v3118_v40  ;;  %v1430_v63 = vpack.c.bf16 %v1415_v30, %v1414_v21  ;;  %v1402_v34 = vmax.f32 %v1352_v17, 0.0  ;;  %v1420_v25 = vadd.f32 %v1404_v49, %v3055_v15 }
 0x578   :  { %v1354_v23 = vpop.f32.mrf.mxu1  ;;  %v3152_v7 = vand.u32 127, %v1606_v59 }
 0x579   :  { %v1405_v55 = vmax.f32 %v1363_v52, 0.0  ;;  %v1355_v20 = vadd.f32 %v3118_v40, %v1354_v23  ;;  %2202 = vmatprep.mubr.bf16.mxu0 %v1430_v63  ;;  %v1418_v57 = vadd.f32 %v1402_v34, %v3049_v53 }
 0x57a   :  { %v2180_v1 = vpop.f32.mrf.mxu1  ;;  %2203 = vmatmul.mubr.bf16.vlgmr.msra.gmra.mxu0 %v1431_v2  ;;  %vm1608_vm0 = vcmp.lt.s32.totalorder %v3152_v7, 4 }
 0x57b   :  { %v1403_v54 = vmax.f32 %v1355_v20, 0.0  ;;  %v1421_v46 = vadd.f32 %v1405_v55, %v3044_v39  ;;  %v1376_v61 = vadd.f32 %v2180_v1, %v3118_v40 }
 0x57c   :  { %v1367_v4 = vpop.f32.mrf.mxu1 }
 0x57d   :  { %v1419_v62 = vadd.f32 %v1403_v54, %v3042_v3  ;;  %v1368_v47 = vadd.f32 %v3118_v40, %v1367_v4  ;;  %v1433_v12 = vpack.c.bf16 %v1421_v46, %v1420_v25  ;;  %v1408_v53 = vmax.f32 %v1376_v61, 0.0 }
 0x57e   :  { %v2181_v0 = vpop.f32.mrf.mxu1 }
 0x57f   :  { %v1379_v8 = vadd.f32 %v2181_v0, %v3118_v40  ;;  %v1432_v14 = vpack.c.bf16 %v1419_v62, %v1418_v57  ;;  %v1406_v44 = vmax.f32 %v1368_v47, 0.0  ;;  %v1424_v58 = vadd.f32 %v1408_v53, %v3085_v33 }
 0x580   :  { %v1370_v22 = vpop.f32.mrf.mxu1 }
 0x581   :  { %v1409_v31 = vmax.f32 %v1379_v8, 0.0  ;;  %v1371_v39 = vadd.f32 %v3118_v40, %v1370_v22  ;;  %2206 = vmatprep.mubr.bf16.mxu0 %v1432_v14  ;;  %v1422_v45 = vadd.f32 %v1406_v44, %v3075_v60 }
 0x582   :  { %v2184_v48 = vpop.f32.mrf.mxu1  ;;  %2207 = vmatmul.mubr.bf16.gmra.mxu0 %v1433_v12 }
 0x583   :  { %v1407_v3 = vmax.f32 %v1371_v39, 0.0  ;;  %v1425_v41 = vadd.f32 %v1409_v31, %v3079_v9  ;;  %v1392_v36 = vadd.f32 %v2184_v48, %v3118_v40 }
 0x584   :  { %v1383_v15 = vpop.f32.mrf.mxu1 }
 0x585   :  { %v1423_v51 = vadd.f32 %v1407_v3, %v3077_v43  ;;  %v1384_v29 = vadd.f32 %v3118_v40, %v1383_v15  ;;  %v1435_v19 = vpack.c.bf16 %v1425_v41, %v1424_v58  ;;  %v1412_v60 = vmax.f32 %v1392_v36, 0.0 }
 0x586   :  { %v2185_v38 = vpop.f32.mrf.mxu1 }
 0x587   :  { %v1395_v27 = vadd.f32 %v2185_v38, %v3118_v40  ;;  %v1434_v5 = vpack.c.bf16 %v1423_v51, %v1422_v45  ;;  %v1410_v6 = vmax.f32 %v1384_v29, 0.0  ;;  %v1428_v28 = vadd.f32 %v1412_v60, %v3099_v35 }
 0x588   :  { %v1386_v37 = vpop.f32.mrf.mxu1 }
 0x589   :  { %v1413_v50 = vmax.f32 %v1395_v27, 0.0  ;;  %v1387_v9 = vadd.f32 %v3118_v40, %v1386_v37  ;;  %2210 = vmatprep.mubr.bf16.mxu1 %v1434_v5  ;;  %v1426_v33 = vadd.f32 %v1410_v6, %v3091_v26  ;;  %v1873_v40 = vld [vmem:[%s3335_s9] ss:$0 sm:$0xff] }
 0x58a   :  { %2211 = vmatmul.mubr.bf16.vlgmr.msra.gmra.mxu1 %v1435_v19 }
 0x58b   :  { %v1411_v43 = vmax.f32 %v1387_v9, 0.0  ;;  %v1429_v11 = vadd.f32 %v1413_v50, %v3097_v56 }
 0x58d   :  { %v1427_v16 = vadd.f32 %v1411_v43, %v3093_v24  ;;  %v1437_v10 = vpack.c.bf16 %v1429_v11, %v1428_v28 }
 0x58f   :  { %v1436_v42 = vpack.c.bf16 %v1427_v16, %v1426_v33 }
 0x591   :  { %2214 = vmatprep.mubr.bf16.mxu1 %v1436_v42 }
 0x592   :  { %2215 = vmatmul.mubr.bf16.gmra.mxu1 %v1437_v10 }
 0x63a   :  { %v2204_v21 = vpop.f32.mrf.mxu0 }
 0x63b   :  { %v1552_v56 = vadd.f32 %v2204_v21, %v1873_v40 }
 0x63c   :  { %v1543_v26 = vpop.f32.mrf.mxu0 }
 0x63d   :  { %v1544_v30 = vadd.f32 %v1873_v40, %v1543_v26  ;;  %v1611_v24 = vsel %vm1608_vm0, %v1552_v56, -1e+30 }
 0x63e   :  { %1629 = vmax.xlane.f32.xlu1 %v1611_v24  ;;  %v2205_v35 = vpop.f32.mrf.mxu0 }
 0x63f   :  { %v1555_v17 = vadd.f32 %v2205_v35, %v1873_v40  ;;  %v1609_v32 = vsel %vm1608_vm0, %v1544_v30, -1e+30 }
 0x640   :  { %v1546_v18 = vpop.f32.mrf.mxu0  ;;  %1625 = vmax.xlane.f32.xlu0 %v1609_v32 }
 0x641   :  { %v1547_v13 = vadd.f32 %v1873_v40, %v1546_v18  ;;  %v1612_v52 = vsel %vm1608_vm0, %v1555_v17, -1e+30 }
 0x642   :  { %1631 = vmax.xlane.f32.xlu1 %v1612_v52  ;;  %v2208_v63 = vpop.f32.mrf.mxu0 }
 0x643   :  { %v1568_v2 = vadd.f32 %v2208_v63, %v1873_v40  ;;  %v1610_v23 = vsel %vm1608_vm0, %v1547_v13, -1e+30 }
 0x644   :  { %v1559_v34 = vpop.f32.mrf.mxu0  ;;  %1627 = vmax.xlane.f32.xlu0 %v1610_v23 }
 0x645   :  { %v1560_v20 = vadd.f32 %v1873_v40, %v1559_v34  ;;  %v1615_v1 = vsel %vm1608_vm0, %v1568_v2, -1e+30 }
 0x646   :  { %v2209_v55 = vpop.f32.mrf.mxu0 }
 0x647   :  { %v1571_v49 = vadd.f32 %v2209_v55, %v1873_v40  ;;  %v1613_v47 = vsel %vm1608_vm0, %v1560_v20, -1e+30 }
 0x648   :  { %v1562_v54 = vpop.f32.mrf.mxu0  ;;  %1637 = vmax.xlane.f32.xlu0 %v1615_v1 }
 0x649   :  { %v1563_v46 = vadd.f32 %v1873_v40, %v1562_v54  ;;  %v1616_v4 = vsel %vm1608_vm0, %v1571_v49, -1e+30 }
 0x64a   :  { %1639 = vmax.xlane.f32.xlu1 %v1616_v4  ;;  %v2212_v57 = vpop.f32.mrf.mxu1 }
 0x64b   :  { %v1584_v62 = vadd.f32 %v2212_v57, %v1873_v40  ;;  %v1614_v61 = vsel %vm1608_vm0, %v1563_v46, -1e+30 }
 0x64c   :  { %1633 = vmax.xlane.f32.xlu0 %v1613_v47  ;;  %v1575_v25 = vpop.f32.mrf.mxu1 }
 0x64d   :  { %v1576_v8 = vadd.f32 %v1873_v40, %v1575_v25  ;;  %v1619_v22 = vsel %vm1608_vm0, %v1584_v62, -1e+30 }
 0x64e   :  { %1635 = vmax.xlane.f32.xlu1 %v1614_v61  ;;  %v2213_v0 = vpop.f32.mrf.mxu1 }
 0x64f   :  { %v1587_v14 = vadd.f32 %v2213_v0, %v1873_v40  ;;  %v3180_v53 = vsel %vm1608_vm0, %v1576_v8, -1e+30 }
 0x650   :  { %1645 = vmax.xlane.f32.xlu0 %v1619_v22  ;;  %v1578_v12 = vpop.f32.mrf.mxu1 }
 0x651   :  { %v1579_v44 = vadd.f32 %v1873_v40, %v1578_v12  ;;  %v1620_v31 = vsel %vm1608_vm0, %v1587_v14, -1e+30 }
 0x652   :  { %1647 = vmax.xlane.f32.xlu1 %v1620_v31  ;;  %v2216_v39 = vpop.f32.mrf.mxu1 }
 0x653   :  { %v3185_v41 = vsel %vm1608_vm0, %v1579_v44, -1e+30  ;;  %v1600_v45 = vadd.f32 %v2216_v39, %v1873_v40 }
 0x654   :  { %1641 = vmax.xlane.f32.xlu0 %v3180_v53  ;;  %v1591_v48 = vpop.f32.mrf.mxu1 }
 0x655   :  { %v1592_v3 = vadd.f32 %v1873_v40, %v1591_v48  ;;  %v3199_v27 = vsel %vm1608_vm0, %v1600_v45, -1e+30 }
 0x656   :  { %1643 = vmax.xlane.f32.xlu1 %v3185_v41  ;;  %v2217_v15 = vpop.f32.mrf.mxu1 }
 0x657   :  { %v3190_v51 = vsel %vm1608_vm0, %v1592_v3, -1e+30  ;;  %v1603_v36 = vadd.f32 %v2217_v15, %v1873_v40 }
 0x658   :  { %v1594_v29 = vpop.f32.mrf.mxu1  ;;  %1649 = vmax.xlane.f32.xlu0 %v3190_v51 }
 0x659   :  { %v1595_v58 = vadd.f32 %v1873_v40, %v1594_v29  ;;  %v3205_v5 = vsel %vm1608_vm0, %v1603_v36, -1e+30 }
 0x65b   :  { %v3195_v38 = vsel %vm1608_vm0, %v1595_v58, -1e+30 }
 0x65c   :  { %1651 = vmax.xlane.f32.xlu1 %v3195_v38  ;;  %1653 = vmax.xlane.f32.xlu0 %v3199_v27 }
 0x660   :  { %1655 = vmax.xlane.f32.xlu1 %v3205_v5 }
 0x6c7   :  { %v1630_v19 = vpop.xlane.xlu1 %1629 }
 0x6c8   :  { %v3208_v37 = vsub.f32 %v1611_v24, %v1630_v19 }
 0x6c9   :  { %v1626_v6 = vpop.xlane.xlu0 %1625 }
 0x6ca   :  { %v1677_v50 = vmul.f32 1.442695, %v3208_v37  ;;  %v3211_v9 = vsub.f32 %v1609_v32, %v1626_v6 }
 0x6cb   :  { %v1632_v60 = vpop.xlane.xlu1 %1631 }
 0x6cc   :  { %2291 = vpow2.f32 %v1677_v50  ;;  %v1673_v43 = vmul.f32 1.442695, %v3211_v9  ;;  %v3214_v11 = vsub.f32 %v1612_v52, %v1632_v60 }
 0x6cd   :  { %v1628_v33 = vpop.xlane.xlu0 %1627 }
 0x6ce   :  { %v1679_v16 = vmul.f32 1.442695, %v3214_v11  ;;  %v3217_v28 = vsub.f32 %v1610_v23, %v1628_v33  ;;  %2293 = vpow2.f32 %v1673_v43 }
 0x6d0   :  { %2295 = vpow2.f32 %v1679_v16  ;;  %v1675_v42 = vmul.f32 1.442695, %v3217_v28 }
 0x6d1   :  { %v1638_v10 = vpop.xlane.xlu0 %1637 }
 0x6d2   :  { %v3220_v59 = vsub.f32 %v1615_v1, %v1638_v10  ;;  %2297 = vpow2.f32 %v1675_v42 }
 0x6d3   :  { %v1640_v7 = vpop.xlane.xlu1 %1639 }
 0x6d4   :  { %v1685_v40 = vmul.f32 1.442695, %v3220_v59  ;;  %v3223_v21 = vsub.f32 %v1616_v4, %v1640_v7 }
 0x6d5   :  { %v1634_v56 = vpop.xlane.xlu0 %1633 }
 0x6d6   :  { %2299 = vpow2.f32 %v1685_v40  ;;  %v1687_v26 = vmul.f32 1.442695, %v3223_v21  ;;  %v3226_v30 = vsub.f32 %v1613_v47, %v1634_v56 }
 0x6d7   :  { %v1636_v24 = vpop.xlane.xlu1 %1635 }
 0x6d8   :  { %2301 = vpow2.f32 %v1687_v26  ;;  %v1681_v35 = vmul.f32 1.442695, %v3226_v30  ;;  %v3229_v17 = vsub.f32 %v1614_v61, %v1636_v24 }
 0x6d9   :  { %v2292_v32 = vpop.eup %2291  ;;  %v1646_v18 = vpop.xlane.xlu0 %1645 }
 0x6da   :  { %2303 = vpow2.f32 %v1681_v35  ;;  %v1683_v13 = vmul.f32 1.442695, %v3229_v17  ;;  %v3232_v52 = vsub.f32 %v1619_v22, %v1646_v18  ;;  %1709 = vadd.xlane.f32.xlu0 %v2292_v32 }
 0x6db   :  { %v1648_v63 = vpop.xlane.xlu1 %1647  ;;  %v2294_v2 = vpop.eup %2293 }
 0x6dc   :  { %2305 = vpow2.f32 %v1683_v13  ;;  %v1693_v23 = vmul.f32 1.442695, %v3232_v52  ;;  %v3235_v34 = vsub.f32 %v1620_v31, %v1648_v63 }
 0x6dd   :  { %v2296_v55 = vpop.eup %2295  ;;  %v1642_v20 = vpop.xlane.xlu0 %1641 }
 0x6de   :  { %2307 = vpow2.f32 %v1693_v23  ;;  %v1695_v49 = vmul.f32 1.442695, %v3235_v34  ;;  %v3239_v1 = vsub.f32 %v3180_v53, %v1642_v20  ;;  %1711 = vadd.xlane.f32.xlu1 %v2296_v55  ;;  %1705 = vadd.xlane.f32.xlu0 %v2294_v2 }
 0x6df   :  { %v1644_v54 = vpop.xlane.xlu1 %1643  ;;  %v2298_v57 = vpop.eup %2297 }
 0x6e0   :  { %2309 = vpow2.f32 %v1695_v49  ;;  %v1689_v46 = vmul.f32 1.442695, %v3239_v1  ;;  %v3243_v4 = vsub.f32 %v3185_v41, %v1644_v54 }
 0x6e1   :  { %v1650_v62 = vpop.xlane.xlu0 %1649 }
 0x6e2   :  { %2311 = vpow2.f32 %v1689_v46  ;;  %v1691_v47 = vmul.f32 1.442695, %v3243_v4  ;;  %v3247_v25 = vsub.f32 %v3190_v51, %v1650_v62  ;;  %1707 = vadd.xlane.f32.xlu1 %v2298_v57 }
 0x6e3   :  { %v2300_v61 = vpop.eup %2299 }
 0x6e4   :  { %2313 = vpow2.f32 %v1691_v47  ;;  %v1697_v0 = vmul.f32 1.442695, %v3247_v25  ;;  %1717 = vadd.xlane.f32.xlu0 %v2300_v61 }
 0x6e5   :  { %v2302_v8 = vpop.eup %2301  ;;  %v1652_v14 = vpop.xlane.xlu1 %1651 }
 0x6e6   :  { %v1654_v22 = vpop.xlane.xlu0 %1653  ;;  %2315 = vpow2.f32 %v1697_v0  ;;  %v3251_v12 = vsub.f32 %v3195_v38, %v1652_v14  ;;  %1719 = vadd.xlane.f32.xlu1 %v2302_v8 }
 0x6e7   :  { %v3254_v44 = vsub.f32 %v3199_v27, %v1654_v22  ;;  %v2304_v31 = vpop.eup %2303 }
 0x6e8   :  { %v1699_v39 = vmul.f32 1.442695, %v3251_v12  ;;  %1713 = vadd.xlane.f32.xlu0 %v2304_v31 }
 0x6e9   :  { %v1701_v53 = vmul.f32 1.442695, %v3254_v44  ;;  %v2306_v48 = vpop.eup %2305  ;;  %v1656_v3 = vpop.xlane.xlu1 %1655 }
 0x6ea   :  { %2317 = vpow2.f32 %v1699_v39  ;;  %v3259_v41 = vsub.f32 %v3205_v5, %v1656_v3  ;;  %1715 = vadd.xlane.f32.xlu1 %v2306_v48 }
 0x6eb   :  { %v2308_v15 = vpop.eup %2307  ;;  %2319 = vpow2.f32 %v1701_v53 }
 0x6ec   :  { %v1703_v45 = vmul.f32 1.442695, %v3259_v41  ;;  %1725 = vadd.xlane.f32.xlu0 %v2308_v15 }
 0x6ed   :  { %v2310_v51 = vpop.eup %2309 }
 0x6ee   :  { %2321 = vpow2.f32 %v1703_v45  ;;  %1727 = vadd.xlane.f32.xlu1 %v2310_v51 }
 0x6ef   :  { %v2312_v29 = vpop.eup %2311 }
 0x6f0   :  { %1721 = vadd.xlane.f32.xlu0 %v2312_v29 }
 0x6f1   :  { %v2314_v58 = vpop.eup %2313 }
 0x6f2   :  { %1723 = vadd.xlane.f32.xlu1 %v2314_v58 }
 0x6f3   :  { %v2316_v36 = vpop.eup %2315 }
 0x6f4   :  { %1729 = vadd.xlane.f32.xlu0 %v2316_v36 }
 0x6f7   :  { %v2318_v38 = vpop.eup %2317 }
 0x6f8   :  { %v2320_v27 = vpop.eup %2319  ;;  %1731 = vadd.xlane.f32.xlu1 %v2318_v38 }
 0x6f9   :  { %1733 = vadd.xlane.f32.xlu0 %v2320_v27 }
 0x6fb   :  { %v2322_v5 = vpop.eup %2321 }
 0x6fc   :  { %1735 = vadd.xlane.f32.xlu1 %v2322_v5 }
 0x763   :  { %v1710_v19 = vpop.xlane.xlu0 %1709 }
 0x764   :  { %2323 = vlog2.f32 %v1710_v19 }
 0x767   :  { %v1712_v6 = vpop.xlane.xlu1 %1711  ;;  %v1706_v50 = vpop.xlane.xlu0 %1705 }
 0x768   :  { %2325 = vlog2.f32 %v1712_v6 }
 0x769   :  { %2327 = vlog2.f32 %v1706_v50 }
 0x76b   :  { %v1708_v60 = vpop.xlane.xlu1 %1707 }
 0x76c   :  { %2329 = vlog2.f32 %v1708_v60 }
 0x76d   :  { %v1718_v43 = vpop.xlane.xlu0 %1717 }
 0x76e   :  { %2331 = vlog2.f32 %v1718_v43 }
 0x76f   :  { %v1720_v33 = vpop.xlane.xlu1 %1719 }
 0x770   :  { %2333 = vlog2.f32 %v1720_v33 }
 0x771   :  { %v2324_v16 = vpop.eup %2323  ;;  %v1714_v42 = vpop.xlane.xlu0 %1713 }
 0x772   :  { %v1742_v10 = vmul.f32 0.6931472, %v2324_v16  ;;  %2335 = vlog2.f32 %v1714_v42 }
 0x773   :  { %v1716_v7 = vpop.xlane.xlu1 %1715 }
 0x774   :  { %v1771_v40 = vsub.f32 %v3208_v37, %v1742_v10  ;;  %2337 = vlog2.f32 %v1716_v7 }
 0x775   :  { %v2326_v56 = vpop.eup %2325  ;;  %v1726_v26 = vpop.xlane.xlu0 %1725 }
 0x776   :  { %v2328_v24 = vpop.eup %2327  ;;  %1787 = vst [vmem:[%s3336_s10 + $0x10] sm:$0xff] %v1771_v40  ;;  %v1744_v35 = vmul.f32 0.6931472, %v2326_v56  ;;  %2339 = vlog2.f32 %v1726_v26 }
 0x777   :  { %v1738_v32 = vmul.f32 0.6931472, %v2328_v24  ;;  %v1728_v18 = vpop.xlane.xlu1 %1727 }
 0x778   :  { %v1772_v13 = vsub.f32 %v3214_v11, %v1744_v35  ;;  %2341 = vlog2.f32 %v1728_v18 }
 0x779   :  { %v2330_v63 = vpop.eup %2329  ;;  %v1769_v2 = vsub.f32 %v3211_v9, %v1738_v32  ;;  %v1722_v23 = vpop.xlane.xlu0 %1721 }
 0x77a   :  { %1788 = vst [vmem:[%s3336_s10 + $0x18] sm:$0xff] %v1772_v13  ;;  %v1740_v37 = vmul.f32 0.6931472, %v2330_v63  ;;  %2343 = vlog2.f32 %v1722_v23 }
 0x77b   :  { %v2332_v55 = vpop.eup %2331  ;;  %1785 = vst [vmem:[%s3336_s10] sm:$0xff] %v1769_v2  ;;  %v1724_v20 = vpop.xlane.xlu1 %1723 }
 0x77c   :  { %v1770_v49 = vsub.f32 %v3217_v28, %v1740_v37  ;;  %v1750_v11 = vmul.f32 0.6931472, %v2332_v55  ;;  %2345 = vlog2.f32 %v1724_v20 }
 0x77d   :  { %v2334_v54 = vpop.eup %2333  ;;  %v1730_v46 = vpop.xlane.xlu0 %1729 }
 0x77e   :  { %1786 = vst [vmem:[%s3336_s10 + $0x8] sm:$0xff] %v1770_v49  ;;  %v1775_v9 = vsub.f32 %v3220_v59, %v1750_v11  ;;  %v1752_v57 = vmul.f32 0.6931472, %v2334_v54  ;;  %2347 = vlog2.f32 %v1730_v46 }
 0x77f   :  { %v2336_v62 = vpop.eup %2335 }
 0x780   :  { %1791 = vst [vmem:[%s3336_s10 + $0x30] sm:$0xff] %v1775_v9  ;;  %v1776_v47 = vsub.f32 %v3223_v21, %v1752_v57  ;;  %v1746_v28 = vmul.f32 0.6931472, %v2336_v62 }
 0x781   :  { %v2338_v61 = vpop.eup %2337  ;;  %v1732_v0 = vpop.xlane.xlu1 %1731 }
 0x782   :  { %1792 = vst [vmem:[%s3336_s10 + $0x38] sm:$0xff] %v1776_v47  ;;  %v1773_v8 = vsub.f32 %v3226_v30, %v1746_v28  ;;  %v1748_v14 = vmul.f32 0.6931472, %v2338_v61  ;;  %2349 = vlog2.f32 %v1732_v0  ;;  %v1734_v59 = vpop.xlane.xlu0 %1733 }
 0x783   :  { %v2340_v22 = vpop.eup %2339  ;;  %2351 = vlog2.f32 %v1734_v59 }
 0x784   :  { %1789 = vst [vmem:[%s3336_s10 + $0x20] sm:$0xff] %v1773_v8  ;;  %v1774_v21 = vsub.f32 %v3229_v17, %v1748_v14  ;;  %v1758_v31 = vmul.f32 0.6931472, %v2340_v22 }
 0x785   :  { %v2342_v39 = vpop.eup %2341  ;;  %v1736_v53 = vpop.xlane.xlu1 %1735 }
 0x786   :  { %1790 = vst [vmem:[%s3336_s10 + $0x28] sm:$0xff] %v1774_v21  ;;  %v1779_v30 = vsub.f32 %v3232_v52, %v1758_v31  ;;  %v1760_v48 = vmul.f32 0.6931472, %v2342_v39  ;;  %2353 = vlog2.f32 %v1736_v53 }
 0x787   :  { %v2344_v3 = vpop.eup %2343 }
 0x788   :  { %1795 = vst [vmem:[%s3336_s10 + $0x50] sm:$0xff] %v1779_v30  ;;  %v1780_v15 = vsub.f32 %v3235_v34, %v1760_v48  ;;  %v1754_v45 = vmul.f32 0.6931472, %v2344_v3 }
 0x789   :  { %v2346_v17 = vpop.eup %2345 }
 0x78a   :  { %1796 = vst [vmem:[%s3336_s10 + $0x58] sm:$0xff] %v1780_v15  ;;  %v1777_v51 = vsub.f32 %v3239_v1, %v1754_v45  ;;  %v1756_v29 = vmul.f32 0.6931472, %v2346_v17 }
 0x78b   :  { %v2348_v58 = vpop.eup %2347 }
 0x78c   :  { %1793 = vst [vmem:[%s3336_s10 + $0x40] sm:$0xff] %v1777_v51  ;;  %v1778_v52 = vsub.f32 %v3243_v4, %v1756_v29  ;;  %v1762_v36 = vmul.f32 0.6931472, %v2348_v58 }
 0x78e   :  { %1794 = vst [vmem:[%s3336_s10 + $0x48] sm:$0xff] %v1778_v52  ;;  %v1781_v34 = vsub.f32 %v3247_v25, %v1762_v36 }
 0x78f   :  { %v2350_v38 = vpop.eup %2349 }
 0x790   :  { %v2352_v27 = vpop.eup %2351  ;;  %1797 = vst [vmem:[%s3336_s10 + $0x60] sm:$0xff] %v1781_v34  ;;  %v1764_v1 = vmul.f32 0.6931472, %v2350_v38 }
 0x791   :  { %v1766_v5 = vmul.f32 0.6931472, %v2352_v27 }
 0x792   :  { %v1782_v19 = vsub.f32 %v3251_v12, %v1764_v1 }
 0x793   :  { %v2354_v6 = vpop.eup %2353  ;;  %v1783_v4 = vsub.f32 %v3254_v44, %v1766_v5 }
 0x794   :  { %1798 = vst [vmem:[%s3336_s10 + $0x68] sm:$0xff] %v1782_v19  ;;  %v1768_v50 = vmul.f32 0.6931472, %v2354_v6 }
 0x795   :  { %1799 = vst [vmem:[%s3336_s10 + $0x70] sm:$0xff] %v1783_v4 }
 0x796   :  { %v1784_v25 = vsub.f32 %v3259_v41, %v1768_v50 }
 0x798   :  { %1800 = vst [vmem:[%s3336_s10 + $0x78] sm:$0xff] %v1784_v25 }
 0x799   :  { %1805 = vsyncpa [#allocation3], 1 }

</bundles_post_ra>
